<compile_context>
chip_gen: v6e
topology: v6e:2x2x1
jax: 0.10.0
libtpu: 0.0.40
codegen_flags: <defaults>
</compile_context>

<pallas_src>
import functools

import jax
import jax.numpy as jnp
from jax.experimental import pallas as pl
from jax.experimental.pallas import tpu as pltpu

GROUPS = 8      # nn.GroupNorm(groups=8, dim_out)
EPS = 1e-5      # GroupNorm / weight-standardization eps (f32)


# ----------------------------------------------------------------------------
# Fused Pallas kernel: conv3x3 (weight-standardized) -> GroupNorm -> +e -> SiLU
# Layout inside the kernel: channels in sublanes, flattened H*W in lanes.
# ----------------------------------------------------------------------------
def _fused_ws_block_kernel(x_ref, ext_ref, mask_ref, w_ref, b_ref, pool_ref,
                           wc_ref, g_ref, bt_ref, o_ref, p_ref,
                           *, H, W, nb, eps):
    cin = x_ref.shape[1]
    hw = H * W
    offs = [(oy, ox) for oy in (-1, 0, 1) for ox in (-1, 0, 1)]

    # --- im2col patches into VMEM scratch: P[(dy*3+dx)*Cin + c, b*hw + p] ----
    # Each tap is a static lane-shifted slice of the zero-haloed flat image;
    # border masks (precomputed in the wrapper) kill the row-wrap reads.
    for b in range(nb):
        xb = x_ref[b]                                        # (Cin, hw), lane-dense
        zero = jnp.zeros_like(xb)
        xpad = jnp.concatenate([zero, xb, zero], axis=1)     # (Cin, 3*hw) flat halo
        for t, (oy, ox) in enumerate(offs):
            s = oy * W + ox
            if oy == 0 and ox == 0:
                tap = xb                                     # centre tap: no shift/mask
            elif ox == 0:
                tap = xpad[:, hw + s:2 * hw + s]             # zero halo handles top/bottom
            else:
                tap = xpad[:, hw + s:2 * hw + s] * mask_ref[t:t + 1, :]
            p_ref[t * cin:(t + 1) * cin, b * hw:(b + 1) * hw] = tap

    # --- 3x3 conv as ONE MXU matmul: (Cout, 9*Cin) @ (9*Cin, nb*hw) ----------
    acc = jnp.dot(w_ref[...], p_ref[...],
                  preferred_element_type=jnp.float32) + b_ref[...]   # (Cout, nb*hw)

    # --- per-batch GroupNorm (two-pass var) -> + e -> SiLU -------------------
    inv_hw = 1.0 / hw
    gamma = g_ref[...]                                       # (Cout, 1)
    beta = bt_ref[...]                                       # (Cout, 1) incl. eproj bias
    for b in range(nb):
        yb = acc[:, b * hw:(b + 1) * hw]                     # (Cout, hw) aligned slice
        mean_c = jnp.sum(yb, axis=1, keepdims=True) * inv_hw           # (Cout, 1)
        mean_g = jnp.dot(pool_ref[...], mean_c,
                         preferred_element_type=jnp.float32)           # group mean / chan
        cent = yb - mean_g
        var_c = jnp.sum(cent * cent, axis=1, keepdims=True) * inv_hw
        var_g = jnp.dot(pool_ref[...], var_c,
                        preferred_element_type=jnp.float32)            # group var / chan
        yn = cent * jax.lax.rsqrt(var_g + eps) * gamma + beta

        # e = eproj(ExtData): centre tap of the standardized 3x3 kernel (VPU).
        e = jnp.sum(wc_ref[...] * ext_ref[b], axis=1, keepdims=True)   # (Cout, 1)

        z = yn + e
        o_ref[b] = (z * jax.nn.sigmoid(z)).astype(o_ref.dtype)


# ----------------------------------------------------------------------------
# Wrapper (plain JAX: only free reshapes + tiny weight-side constants)
# ----------------------------------------------------------------------------
def _weight_standardize(w, eps=EPS):
    mean = w.mean(axis=(1, 2, 3), keepdims=True)
    var = w.var(axis=(1, 2, 3), keepdims=True)        # biased (unbiased=False)
    return (w - mean) * jax.lax.rsqrt(var + eps)


def ws_block_extdata(x_nchw, ext, params, *, groups=GROUPS, batch_block=None):
    """Forward of WeightStandardizedBlock_ExtData. x: NCHW, ext: (B,Cin[,1,1])."""
    B, Cin, H, W = x_nchw.shape
    Cout = params['proj_w'].shape[0]
    HW = H * W
    if batch_block is None:
        batch_block = B          # single grid step (v5e/v6e); use 1 on v7x megacore
    assert B % batch_block == 0
    NB = batch_block

    # Free reshapes -- no transpose, no pad, no extra HBM passes over x.
    xf = x_nchw.reshape(B, Cin, HW).astype(jnp.float32)
    extf = ext.reshape(B, 1, Cin).astype(jnp.float32)

    # Weight standardization + tiny constants (weights-only work).
    wstd = _weight_standardize(params['proj_w'])                     # (Cout,Cin,3,3)
    wmat = jnp.transpose(wstd, (0, 2, 3, 1)).reshape(Cout, 9 * Cin)  # cols = (dy,dx,c)
    wstd_e = _weight_standardize(params['eproj_w'])
    # TODO(synk): ExtData is assumed 1x1 spatial; a 3x3 pad=1 conv on a
    # zero-padded 1x1 input reduces exactly to its centre tap.
    wc = wstd_e[:, :, 1, 1]                                          # (Cout, Cin)

    col = lambda v: v.reshape(Cout, 1).astype(jnp.float32)
    bias = col(params['proj_b'])
    gamma = col(params['norm_g'])
    beta_eff = col(params['norm_b'] + params['eproj_b'])             # fold eproj bias

    cg = Cout // groups
    gid = jnp.arange(Cout) // cg
    pool = (gid[:, None] == gid[None, :]).astype(jnp.float32) / cg   # (Cout, Cout)

    # Border masks for the 9 taps (valid-pixel indicator over flattened H*W).
    hh = jnp.arange(HW) // W
    ww = jnp.arange(HW) % W
    masks = jnp.stack(
        [((hh + oy >= 0) & (hh + oy < H) & (ww + ox >= 0) & (ww + ox < W))
         .astype(jnp.float32)
         for oy in (-1, 0, 1) for ox in (-1, 0, 1)], axis=0)         # (9, HW)

    kern = functools.partial(_fused_ws_block_kernel, H=H, W=W, nb=NB, eps=EPS)
    out = pl.pallas_call(
        kern,
        out_shape=jax.ShapeDtypeStruct((B, Cout, HW), jnp.float32),
        grid=(B // NB,),
        in_specs=[
            pl.BlockSpec((NB, Cin, HW), lambda i: (i, 0, 0)),        # x (flat NCHW)
            pl.BlockSpec((NB, 1, Cin), lambda i: (i, 0, 0)),         # ExtData
            pl.BlockSpec((9, HW), lambda i: (0, 0)),                 # tap masks
            pl.BlockSpec((Cout, 9 * Cin), lambda i: (0, 0)),         # conv weights
            pl.BlockSpec((Cout, 1), lambda i: (0, 0)),               # conv bias
            pl.BlockSpec((Cout, Cout), lambda i: (0, 0)),            # group pooling
            pl.BlockSpec((Cout, Cin), lambda i: (0, 0)),             # eproj centre tap
            pl.BlockSpec((Cout, 1), lambda i: (0, 0)),               # gamma
            pl.BlockSpec((Cout, 1), lambda i: (0, 0)),               # beta + eproj_b
        ],
        out_specs=pl.BlockSpec((NB, Cout, HW), lambda i: (i, 0, 0)),
        scratch_shapes=[pltpu.VMEM((9 * Cin, NB * HW), jnp.float32)],  # im2col
        compiler_params=pltpu.CompilerParams(dimension_semantics=("parallel",)),
    )(xf, extf, masks, wmat, bias, pool, wc, gamma, beta_eff)

    return out.reshape(B, Cout, H, W)                                # already NCHW


# ----------------------------------------------------------------------------
# Plain-JAX reference (for a tolerance check)
# ----------------------------------------------------------------------------
def reference(x_nchw, ext, params, *, groups=GROUPS):
    hp = jax.lax.Precision.HIGHEST
    wn = _weight_standardize(params['proj_w'])
    h = jax.lax.conv_general_dilated(
        x_nchw.astype(jnp.float32), wn, (1, 1), 'SAME',
        dimension_numbers=('NCHW', 'OIHW', 'NCHW'), precision=hp)
    h = h + params['proj_b'][None, :, None, None]
    B, C, H, W = h.shape
    hg = h.reshape(B, groups, C // groups, H, W)
    mu = hg.mean(axis=(2, 3, 4), keepdims=True)
    var = hg.var(axis=(2, 3, 4), keepdims=True)
    hn = ((hg - mu) * jax.lax.rsqrt(var + EPS)).reshape(B, C, H, W)
    hn = hn * params['norm_g'][None, :, None, None] + params['norm_b'][None, :, None, None]
    wne = _weight_standardize(params['eproj_w'])
    e = jnp.dot(ext.reshape(B, -1), wne[:, :, 1, 1].T, precision=hp) + params['eproj_b']
    y = hn + e[:, :, None, None]
    return y * jax.nn.sigmoid(y)


if __name__ == "__main__":
    B, CIN, COUT, H, W = 2, 8, 32, 16, 16
    key = jax.random.PRNGKey(0)
    kx, ke, k1, k2, k3, k4, k5, k6 = jax.random.split(key, 8)
    inData = jax.random.normal(kx, (B, CIN, H, W), jnp.float32)      # NCHW like PyTorch
    inExtData = jax.random.normal(ke, (B, CIN, 1, 1), jnp.float32)   # conditioning, 1x1
    params = {
        'proj_w': 0.1 * jax.random.normal(k1, (COUT, CIN, 3, 3), jnp.float32),
        'proj_b': 0.1 * jax.random.normal(k2, (COUT,), jnp.float32),
        'norm_g': 1.0 + 0.1 * jax.random.normal(k3, (COUT,), jnp.float32),
        'norm_b': 0.1 * jax.random.normal(k4, (COUT,), jnp.float32),
        'eproj_w': 0.1 * jax.random.normal(k5, (COUT, CIN, 3, 3), jnp.float32),
        'eproj_b': 0.1 * jax.random.normal(k6, (COUT,), jnp.float32),
    }

    out = jax.jit(ws_block_extdata)(inData, inExtData, params)
    jax.block_until_ready(out)
    assert out.shape == (B, COUT, H, W) and out.dtype == jnp.float32

    ref = reference(inData, inExtData, params)
    err = float(jnp.max(jnp.abs(out - ref)))
    assert jnp.allclose(out, ref, atol=2e-2, rtol=2e-2), f"max abs err {err}"
    print("KERNEL_OK")
</pallas_src>

<mosaic_0001>
module attributes {stable_mosaic.version = 11 : i64} {
  func.func @_fused_ws_block_kernel(%arg0: i32, %arg1: memref<2x8x256xf32, #tpu.memory_space<vmem>>, %arg2: memref<2x1x8xf32, #tpu.memory_space<vmem>>, %arg3: memref<9x256xf32, #tpu.memory_space<vmem>>, %arg4: memref<32x72xf32, #tpu.memory_space<vmem>>, %arg5: memref<32x1xf32, #tpu.memory_space<vmem>>, %arg6: memref<32x32xf32, #tpu.memory_space<vmem>>, %arg7: memref<32x8xf32, #tpu.memory_space<vmem>>, %arg8: memref<32x1xf32, #tpu.memory_space<vmem>>, %arg9: memref<32x1xf32, #tpu.memory_space<vmem>>, %arg10: memref<2x32x256xf32, #tpu.memory_space<vmem>>, %arg11: memref<72x512xf32, #tpu.memory_space<vmem>>) attributes {dimension_semantics = [#tpu.dimension_semantics<parallel>], iteration_bounds = array<i64: 1>, scalar_prefetch = 0 : i64, scratch_operands = 1 : i64, tpu.core_type = #tpu.core_type<tc>, window_params = [{transform_indices = @transform_0, window_bounds = array<i64: 2, 8, 256>}, {transform_indices = @transform_1, window_bounds = array<i64: 2, 1, 8>}, {pipeline_mode = #tpu.pipeline_mode<synchronous>, transform_indices = @transform_2, window_bounds = array<i64: 9, 256>}, {pipeline_mode = #tpu.pipeline_mode<synchronous>, transform_indices = @transform_3, window_bounds = array<i64: 32, 72>}, {pipeline_mode = #tpu.pipeline_mode<synchronous>, transform_indices = @transform_4, window_bounds = array<i64: 32, 1>}, {pipeline_mode = #tpu.pipeline_mode<synchronous>, transform_indices = @transform_5, window_bounds = array<i64: 32, 32>}, {pipeline_mode = #tpu.pipeline_mode<synchronous>, transform_indices = @transform_6, window_bounds = array<i64: 32, 8>}, {pipeline_mode = #tpu.pipeline_mode<synchronous>, transform_indices = @transform_7, window_bounds = array<i64: 32, 1>}, {pipeline_mode = #tpu.pipeline_mode<synchronous>, transform_indices = @transform_8, window_bounds = array<i64: 32, 1>}, {transform_indices = @transform_9, window_bounds = array<i64: 2, 32, 256>}]} {
    %c0 = arith.constant 0 : index
    %c0_0 = arith.constant 0 : index
    %c0_1 = arith.constant 0 : index
    %0 = vector.load %arg1[%c0, %c0_0, %c0_1] : memref<2x8x256xf32, #tpu.memory_space<vmem>>, vector<1x8x256xf32>
    %1 = vector.shape_cast %0 : vector<1x8x256xf32> to vector<8x256xf32>
    %cst = arith.constant 0.000000e+00 : f32
    %2 = vector.broadcast %cst : f32 to vector<8x256xf32>
    %3 = tpu.concatenate %2, %1, %2 in 1 : vector<8x256xf32>, vector<8x256xf32>, vector<8x256xf32> -> vector<8x768xf32>
    %4 = vector.extract_strided_slice %3 {offsets = [0, 239], sizes = [8, 256], strides = [1, 1]} : vector<8x768xf32> to vector<8x256xf32>
    %c0_2 = arith.constant 0 : index
    %c0_3 = arith.constant 0 : index
    %5 = vector.load %arg3[%c0_2, %c0_3] : memref<9x256xf32, #tpu.memory_space<vmem>>, vector<1x256xf32>
    %6 = vector.broadcast %5 : vector<1x256xf32> to vector<8x256xf32>
    %7 = arith.mulf %4, %6 : vector<8x256xf32>
    %c0_4 = arith.constant 0 : index
    %c0_5 = arith.constant 0 : index
    %8 = vector.load %arg11[%c0_4, %c0_5] : memref<72x512xf32, #tpu.memory_space<vmem>>, vector<8x256xf32>
    tpu.vector_store %arg11[%c0_4, %c0_5], %7 {strides = array<i32>} : memref<72x512xf32, #tpu.memory_space<vmem>>, vector<8x256xf32>,
    %9 = vector.extract_strided_slice %3 {offsets = [0, 240], sizes = [8, 256], strides = [1, 1]} : vector<8x768xf32> to vector<8x256xf32>
    %c8 = arith.constant 8 : index
    %c0_6 = arith.constant 0 : index
    %10 = vector.load %arg11[%c8, %c0_6] : memref<72x512xf32, #tpu.memory_space<vmem>>, vector<8x256xf32>
    tpu.vector_store %arg11[%c8, %c0_6], %9 {strides = array<i32>} : memref<72x512xf32, #tpu.memory_space<vmem>>, vector<8x256xf32>,
    %11 = vector.extract_strided_slice %3 {offsets = [0, 241], sizes = [8, 256], strides = [1, 1]} : vector<8x768xf32> to vector<8x256xf32>
    %c2 = arith.constant 2 : index
    %c0_7 = arith.constant 0 : index
    %12 = vector.load %arg3[%c2, %c0_7] : memref<9x256xf32, #tpu.memory_space<vmem>>, vector<1x256xf32>
    %13 = vector.broadcast %12 : vector<1x256xf32> to vector<8x256xf32>
    %14 = arith.mulf %11, %13 : vector<8x256xf32>
    %c16 = arith.constant 16 : index
    %c0_8 = arith.constant 0 : index
    %15 = vector.load %arg11[%c16, %c0_8] : memref<72x512xf32, #tpu.memory_space<vmem>>, vector<8x256xf32>
    tpu.vector_store %arg11[%c16, %c0_8], %14 {strides = array<i32>} : memref<72x512xf32, #tpu.memory_space<vmem>>, vector<8x256xf32>,
    %16 = vector.extract_strided_slice %3 {offsets = [0, 255], sizes = [8, 256], strides = [1, 1]} : vector<8x768xf32> to vector<8x256xf32>
    %c3 = arith.constant 3 : index
    %c0_9 = arith.constant 0 : index
    %17 = vector.load %arg3[%c3, %c0_9] : memref<9x256xf32, #tpu.memory_space<vmem>>, vector<1x256xf32>
    %18 = vector.broadcast %17 : vector<1x256xf32> to vector<8x256xf32>
    %19 = arith.mulf %16, %18 : vector<8x256xf32>
    %c24 = arith.constant 24 : index
    %c0_10 = arith.constant 0 : index
    %20 = vector.load %arg11[%c24, %c0_10] : memref<72x512xf32, #tpu.memory_space<vmem>>, vector<8x256xf32>
    tpu.vector_store %arg11[%c24, %c0_10], %19 {strides = array<i32>} : memref<72x512xf32, #tpu.memory_space<vmem>>, vector<8x256xf32>,
    %c32 = arith.constant 32 : index
    %c0_11 = arith.constant 0 : index
    %21 = vector.load %arg11[%c32, %c0_11] : memref<72x512xf32, #tpu.memory_space<vmem>>, vector<8x256xf32>
    tpu.vector_store %arg11[%c32, %c0_11], %1 {strides = array<i32>} : memref<72x512xf32, #tpu.memory_space<vmem>>, vector<8x256xf32>,
    %22 = vector.extract_strided_slice %3 {offsets = [0, 257], sizes = [8, 256], strides = [1, 1]} : vector<8x768xf32> to vector<8x256xf32>
    %c5 = arith.constant 5 : index
    %c0_12 = arith.constant 0 : index
    %23 = vector.load %arg3[%c5, %c0_12] : memref<9x256xf32, #tpu.memory_space<vmem>>, vector<1x256xf32>
    %24 = vector.broadcast %23 : vector<1x256xf32> to vector<8x256xf32>
    %25 = arith.mulf %22, %24 : vector<8x256xf32>
    %c40 = arith.constant 40 : index
    %c0_13 = arith.constant 0 : index
    %26 = vector.load %arg11[%c40, %c0_13] : memref<72x512xf32, #tpu.memory_space<vmem>>, vector<8x256xf32>
    tpu.vector_store %arg11[%c40, %c0_13], %25 {strides = array<i32>} : memref<72x512xf32, #tpu.memory_space<vmem>>, vector<8x256xf32>,
    %27 = vector.extract_strided_slice %3 {offsets = [0, 271], sizes = [8, 256], strides = [1, 1]} : vector<8x768xf32> to vector<8x256xf32>
    %c6 = arith.constant 6 : index
    %c0_14 = arith.constant 0 : index
    %28 = vector.load %arg3[%c6, %c0_14] : memref<9x256xf32, #tpu.memory_space<vmem>>, vector<1x256xf32>
    %29 = vector.broadcast %28 : vector<1x256xf32> to vector<8x256xf32>
    %30 = arith.mulf %27, %29 : vector<8x256xf32>
    %c48 = arith.constant 48 : index
    %c0_15 = arith.constant 0 : index
    %31 = vector.load %arg11[%c48, %c0_15] : memref<72x512xf32, #tpu.memory_space<vmem>>, vector<8x256xf32>
    tpu.vector_store %arg11[%c48, %c0_15], %30 {strides = array<i32>} : memref<72x512xf32, #tpu.memory_space<vmem>>, vector<8x256xf32>,
    %32 = vector.extract_strided_slice %3 {offsets = [0, 272], sizes = [8, 256], strides = [1, 1]} : vector<8x768xf32> to vector<8x256xf32>
    %c56 = arith.constant 56 : index
    %c0_16 = arith.constant 0 : index
    %33 = vector.load %arg11[%c56, %c0_16] : memref<72x512xf32, #tpu.memory_space<vmem>>, vector<8x256xf32>
    tpu.vector_store %arg11[%c56, %c0_16], %32 {strides = array<i32>} : memref<72x512xf32, #tpu.memory_space<vmem>>, vector<8x256xf32>,
    %34 = vector.extract_strided_slice %3 {offsets = [0, 273], sizes = [8, 256], strides = [1, 1]} : vector<8x768xf32> to vector<8x256xf32>
    %c8_17 = arith.constant 8 : index
    %c0_18 = arith.constant 0 : index
    %35 = vector.load %arg3[%c8_17, %c0_18] : memref<9x256xf32, #tpu.memory_space<vmem>>, vector<1x256xf32>
    %36 = vector.broadcast %35 : vector<1x256xf32> to vector<8x256xf32>
    %37 = arith.mulf %34, %36 : vector<8x256xf32>
    %c64 = arith.constant 64 : index
    %c0_19 = arith.constant 0 : index
    %38 = vector.load %arg11[%c64, %c0_19] : memref<72x512xf32, #tpu.memory_space<vmem>>, vector<8x256xf32>
    tpu.vector_store %arg11[%c64, %c0_19], %37 {strides = array<i32>} : memref<72x512xf32, #tpu.memory_space<vmem>>, vector<8x256xf32>,
    %c1 = arith.constant 1 : index
    %c0_20 = arith.constant 0 : index
    %c0_21 = arith.constant 0 : index
    %39 = vector.load %arg1[%c1, %c0_20, %c0_21] : memref<2x8x256xf32, #tpu.memory_space<vmem>>, vector<1x8x256xf32>
    %40 = vector.shape_cast %39 : vector<1x8x256xf32> to vector<8x256xf32>
    %cst_22 = arith.constant 0.000000e+00 : f32
    %41 = vector.broadcast %cst_22 : f32 to vector<8x256xf32>
    %42 = tpu.concatenate %41, %40, %41 in 1 : vector<8x256xf32>, vector<8x256xf32>, vector<8x256xf32> -> vector<8x768xf32>
    %43 = vector.extract_strided_slice %42 {offsets = [0, 239], sizes = [8, 256], strides = [1, 1]} : vector<8x768xf32> to vector<8x256xf32>
    %c0_23 = arith.constant 0 : index
    %c0_24 = arith.constant 0 : index
    %44 = vector.load %arg3[%c0_23, %c0_24] : memref<9x256xf32, #tpu.memory_space<vmem>>, vector<1x256xf32>
    %45 = vector.broadcast %44 : vector<1x256xf32> to vector<8x256xf32>
    %46 = arith.mulf %43, %45 : vector<8x256xf32>
    %c0_25 = arith.constant 0 : index
    %c256 = arith.constant 256 : index
    %47 = vector.load %arg11[%c0_25, %c256] : memref<72x512xf32, #tpu.memory_space<vmem>>, vector<8x256xf32>
    tpu.vector_store %arg11[%c0_25, %c256], %46 {strides = array<i32>} : memref<72x512xf32, #tpu.memory_space<vmem>>, vector<8x256xf32>,
    %48 = vector.extract_strided_slice %42 {offsets = [0, 240], sizes = [8, 256], strides = [1, 1]} : vector<8x768xf32> to vector<8x256xf32>
    %c8_26 = arith.constant 8 : index
    %c256_27 = arith.constant 256 : index
    %49 = vector.load %arg11[%c8_26, %c256_27] : memref<72x512xf32, #tpu.memory_space<vmem>>, vector<8x256xf32>
    tpu.vector_store %arg11[%c8_26, %c256_27], %48 {strides = array<i32>} : memref<72x512xf32, #tpu.memory_space<vmem>>, vector<8x256xf32>,
    %50 = vector.extract_strided_slice %42 {offsets = [0, 241], sizes = [8, 256], strides = [1, 1]} : vector<8x768xf32> to vector<8x256xf32>
    %c2_28 = arith.constant 2 : index
    %c0_29 = arith.constant 0 : index
    %51 = vector.load %arg3[%c2_28, %c0_29] : memref<9x256xf32, #tpu.memory_space<vmem>>, vector<1x256xf32>
    %52 = vector.broadcast %51 : vector<1x256xf32> to vector<8x256xf32>
    %53 = arith.mulf %50, %52 : vector<8x256xf32>
    %c16_30 = arith.constant 16 : index
    %c256_31 = arith.constant 256 : index
    %54 = vector.load %arg11[%c16_30, %c256_31] : memref<72x512xf32, #tpu.memory_space<vmem>>, vector<8x256xf32>
    tpu.vector_store %arg11[%c16_30, %c256_31], %53 {strides = array<i32>} : memref<72x512xf32, #tpu.memory_space<vmem>>, vector<8x256xf32>,
    %55 = vector.extract_strided_slice %42 {offsets = [0, 255], sizes = [8, 256], strides = [1, 1]} : vector<8x768xf32> to vector<8x256xf32>
    %c3_32 = arith.constant 3 : index
    %c0_33 = arith.constant 0 : index
    %56 = vector.load %arg3[%c3_32, %c0_33] : memref<9x256xf32, #tpu.memory_space<vmem>>, vector<1x256xf32>
    %57 = vector.broadcast %56 : vector<1x256xf32> to vector<8x256xf32>
    %58 = arith.mulf %55, %57 : vector<8x256xf32>
    %c24_34 = arith.constant 24 : index
    %c256_35 = arith.constant 256 : index
    %59 = vector.load %arg11[%c24_34, %c256_35] : memref<72x512xf32, #tpu.memory_space<vmem>>, vector<8x256xf32>
    tpu.vector_store %arg11[%c24_34, %c256_35], %58 {strides = array<i32>} : memref<72x512xf32, #tpu.memory_space<vmem>>, vector<8x256xf32>,
    %c32_36 = arith.constant 32 : index
    %c256_37 = arith.constant 256 : index
    %60 = vector.load %arg11[%c32_36, %c256_37] : memref<72x512xf32, #tpu.memory_space<vmem>>, vector<8x256xf32>
    tpu.vector_store %arg11[%c32_36, %c256_37], %40 {strides = array<i32>} : memref<72x512xf32, #tpu.memory_space<vmem>>, vector<8x256xf32>,
    %61 = vector.extract_strided_slice %42 {offsets = [0, 257], sizes = [8, 256], strides = [1, 1]} : vector<8x768xf32> to vector<8x256xf32>
    %c5_38 = arith.constant 5 : index
    %c0_39 = arith.constant 0 : index
    %62 = vector.load %arg3[%c5_38, %c0_39] : memref<9x256xf32, #tpu.memory_space<vmem>>, vector<1x256xf32>
    %63 = vector.broadcast %62 : vector<1x256xf32> to vector<8x256xf32>
    %64 = arith.mulf %61, %63 : vector<8x256xf32>
    %c40_40 = arith.constant 40 : index
    %c256_41 = arith.constant 256 : index
    %65 = vector.load %arg11[%c40_40, %c256_41] : memref<72x512xf32, #tpu.memory_space<vmem>>, vector<8x256xf32>
    tpu.vector_store %arg11[%c40_40, %c256_41], %64 {strides = array<i32>} : memref<72x512xf32, #tpu.memory_space<vmem>>, vector<8x256xf32>,
    %66 = vector.extract_strided_slice %42 {offsets = [0, 271], sizes = [8, 256], strides = [1, 1]} : vector<8x768xf32> to vector<8x256xf32>
    %c6_42 = arith.constant 6 : index
    %c0_43 = arith.constant 0 : index
    %67 = vector.load %arg3[%c6_42, %c0_43] : memref<9x256xf32, #tpu.memory_space<vmem>>, vector<1x256xf32>
    %68 = vector.broadcast %67 : vector<1x256xf32> to vector<8x256xf32>
    %69 = arith.mulf %66, %68 : vector<8x256xf32>
    %c48_44 = arith.constant 48 : index
    %c256_45 = arith.constant 256 : index
    %70 = vector.load %arg11[%c48_44, %c256_45] : memref<72x512xf32, #tpu.memory_space<vmem>>, vector<8x256xf32>
    tpu.vector_store %arg11[%c48_44, %c256_45], %69 {strides = array<i32>} : memref<72x512xf32, #tpu.memory_space<vmem>>, vector<8x256xf32>,
    %71 = vector.extract_strided_slice %42 {offsets = [0, 272], sizes = [8, 256], strides = [1, 1]} : vector<8x768xf32> to vector<8x256xf32>
    %c56_46 = arith.constant 56 : index
    %c256_47 = arith.constant 256 : index
    %72 = vector.load %arg11[%c56_46, %c256_47] : memref<72x512xf32, #tpu.memory_space<vmem>>, vector<8x256xf32>
    tpu.vector_store %arg11[%c56_46, %c256_47], %71 {strides = array<i32>} : memref<72x512xf32, #tpu.memory_space<vmem>>, vector<8x256xf32>,
    %73 = vector.extract_strided_slice %42 {offsets = [0, 273], sizes = [8, 256], strides = [1, 1]} : vector<8x768xf32> to vector<8x256xf32>
    %c8_48 = arith.constant 8 : index
    %c0_49 = arith.constant 0 : index
    %74 = vector.load %arg3[%c8_48, %c0_49] : memref<9x256xf32, #tpu.memory_space<vmem>>, vector<1x256xf32>
    %75 = vector.broadcast %74 : vector<1x256xf32> to vector<8x256xf32>
    %76 = arith.mulf %73, %75 : vector<8x256xf32>
    %c64_50 = arith.constant 64 : index
    %c256_51 = arith.constant 256 : index
    %77 = vector.load %arg11[%c64_50, %c256_51] : memref<72x512xf32, #tpu.memory_space<vmem>>, vector<8x256xf32>
    tpu.vector_store %arg11[%c64_50, %c256_51], %76 {strides = array<i32>} : memref<72x512xf32, #tpu.memory_space<vmem>>, vector<8x256xf32>,
    %c0_52 = arith.constant 0 : index
    %c0_53 = arith.constant 0 : index
    %78 = vector.load %arg4[%c0_52, %c0_53] : memref<32x72xf32, #tpu.memory_space<vmem>>, vector<32x72xf32>
    %c0_54 = arith.constant 0 : index
    %c0_55 = arith.constant 0 : index
    %79 = vector.load %arg11[%c0_54, %c0_55] : memref<72x512xf32, #tpu.memory_space<vmem>>, vector<72x512xf32>
    %cst_56 = arith.constant dense<0.000000e+00> : vector<32x512xf32>
    %80 = tpu.matmul %78, %79, %cst_56 {dimension_numbers = #tpu.dot_dimension_numbers<[1], [0], [0], [1], [0, 0, 1, 1], [], []>} : vector<32x72xf32>, vector<72x512xf32>, vector<32x512xf32> -> vector<32x512xf32>
    %c0_57 = arith.constant 0 : index
    %c0_58 = arith.constant 0 : index
    %81 = vector.load %arg5[%c0_57, %c0_58] : memref<32x1xf32, #tpu.memory_space<vmem>>, vector<32x1xf32>
    %82 = vector.broadcast %81 : vector<32x1xf32> to vector<32x512xf32>
    %83 = arith.addf %80, %82 : vector<32x512xf32>
    %c0_59 = arith.constant 0 : index
    %c0_60 = arith.constant 0 : index
    %84 = vector.load %arg8[%c0_59, %c0_60] : memref<32x1xf32, #tpu.memory_space<vmem>>, vector<32x1xf32>
    %c0_61 = arith.constant 0 : index
    %c0_62 = arith.constant 0 : index
    %85 = vector.load %arg9[%c0_61, %c0_62] : memref<32x1xf32, #tpu.memory_space<vmem>>, vector<32x1xf32>
    %86 = vector.extract_strided_slice %83 {offsets = [0, 0], sizes = [32, 256], strides = [1, 1]} : vector<32x512xf32> to vector<32x256xf32>
    %cst_63 = arith.constant dense<0.000000e+00> : vector<32xf32>
    %87 = vector.multi_reduction <add>, %86, %cst_63 [1] : vector<32x256xf32> to vector<32xf32>
    %88 = vector.shape_cast %87 : vector<32xf32> to vector<32x1xf32>
    %cst_64 = arith.constant 3.906250e-03 : f32
    %89 = vector.broadcast %cst_64 : f32 to vector<32x1xf32>
    %90 = arith.mulf %88, %89 : vector<32x1xf32>
    %c0_65 = arith.constant 0 : index
    %c0_66 = arith.constant 0 : index
    %91 = vector.load %arg6[%c0_65, %c0_66] : memref<32x32xf32, #tpu.memory_space<vmem>>, vector<32x32xf32>
    %cst_67 = arith.constant dense<0.000000e+00> : vector<32x1xf32>
    %92 = tpu.matmul %91, %90, %cst_67 {dimension_numbers = #tpu.dot_dimension_numbers<[1], [0], [0], [1], [0, 0, 1, 1], [], []>} : vector<32x32xf32>, vector<32x1xf32>, vector<32x1xf32> -> vector<32x1xf32>
    %93 = vector.broadcast %92 : vector<32x1xf32> to vector<32x256xf32>
    %94 = arith.subf %86, %93 : vector<32x256xf32>
    %95 = arith.mulf %94, %94 : vector<32x256xf32>
    %cst_68 = arith.constant dense<0.000000e+00> : vector<32xf32>
    %96 = vector.multi_reduction <add>, %95, %cst_68 [1] : vector<32x256xf32> to vector<32xf32>
    %97 = vector.shape_cast %96 : vector<32xf32> to vector<32x1xf32>
    %cst_69 = arith.constant 3.906250e-03 : f32
    %98 = vector.broadcast %cst_69 : f32 to vector<32x1xf32>
    %99 = arith.mulf %97, %98 : vector<32x1xf32>
    %c0_70 = arith.constant 0 : index
    %c0_71 = arith.constant 0 : index
    %100 = vector.load %arg6[%c0_70, %c0_71] : memref<32x32xf32, #tpu.memory_space<vmem>>, vector<32x32xf32>
    %cst_72 = arith.constant dense<0.000000e+00> : vector<32x1xf32>
    %101 = tpu.matmul %100, %99, %cst_72 {dimension_numbers = #tpu.dot_dimension_numbers<[1], [0], [0], [1], [0, 0, 1, 1], [], []>} : vector<32x32xf32>, vector<32x1xf32>, vector<32x1xf32> -> vector<32x1xf32>
    %cst_73 = arith.constant 9.99999974E-6 : f32
    %102 = vector.broadcast %cst_73 : f32 to vector<32x1xf32>
    %103 = arith.addf %101, %102 : vector<32x1xf32>
    %104 = math.rsqrt %103 : vector<32x1xf32>
    %105 = vector.broadcast %104 : vector<32x1xf32> to vector<32x256xf32>
    %106 = arith.mulf %94, %105 : vector<32x256xf32>
    %107 = vector.broadcast %84 : vector<32x1xf32> to vector<32x256xf32>
    %108 = arith.mulf %106, %107 : vector<32x256xf32>
    %109 = vector.broadcast %85 : vector<32x1xf32> to vector<32x256xf32>
    %110 = arith.addf %108, %109 : vector<32x256xf32>
    %c0_74 = arith.constant 0 : index
    %c0_75 = arith.constant 0 : index
    %111 = vector.load %arg7[%c0_74, %c0_75] : memref<32x8xf32, #tpu.memory_space<vmem>>, vector<32x8xf32>
    %c0_76 = arith.constant 0 : index
    %c0_77 = arith.constant 0 : index
    %c0_78 = arith.constant 0 : index
    %112 = vector.load %arg2[%c0_76, %c0_77, %c0_78] : memref<2x1x8xf32, #tpu.memory_space<vmem>>, vector<1x1x8xf32>
    %113 = vector.shape_cast %112 : vector<1x1x8xf32> to vector<1x8xf32>
    %114 = vector.broadcast %113 : vector<1x8xf32> to vector<32x8xf32>
    %115 = arith.mulf %111, %114 : vector<32x8xf32>
    %cst_79 = arith.constant dense<0.000000e+00> : vector<32xf32>
    %116 = vector.multi_reduction <add>, %115, %cst_79 [1] : vector<32x8xf32> to vector<32xf32>
    %117 = vector.shape_cast %116 : vector<32xf32> to vector<32x1xf32>
    %118 = vector.broadcast %117 : vector<32x1xf32> to vector<32x256xf32>
    %119 = arith.addf %110, %118 : vector<32x256xf32>
    %120 = arith.negf %119 : vector<32x256xf32>
    %121 = math.exp %120 : vector<32x256xf32>
    %cst_80 = arith.constant 1.000000e+00 : f32
    %122 = vector.broadcast %cst_80 : f32 to vector<32x256xf32>
    %123 = arith.addf %122, %121 : vector<32x256xf32>
    %124 = arith.divf %122, %123 : vector<32x256xf32>
    %125 = arith.mulf %119, %124 : vector<32x256xf32>
    %c0_81 = arith.constant 0 : index
    %c0_82 = arith.constant 0 : index
    %c0_83 = arith.constant 0 : index
    %126 = vector.load %arg10[%c0_81, %c0_82, %c0_83] : memref<2x32x256xf32, #tpu.memory_space<vmem>>, vector<1x32x256xf32>
    %127 = vector.shape_cast %126 : vector<1x32x256xf32> to vector<32x256xf32>
    %128 = vector.shape_cast %125 : vector<32x256xf32> to vector<1x32x256xf32>
    tpu.vector_store %arg10[%c0_81, %c0_82, %c0_83], %128 {strides = array<i32>} : memref<2x32x256xf32, #tpu.memory_space<vmem>>, vector<1x32x256xf32>,
    %129 = vector.extract_strided_slice %83 {offsets = [0, 256], sizes = [32, 256], strides = [1, 1]} : vector<32x512xf32> to vector<32x256xf32>
    %cst_84 = arith.constant dense<0.000000e+00> : vector<32xf32>
    %130 = vector.multi_reduction <add>, %129, %cst_84 [1] : vector<32x256xf32> to vector<32xf32>
    %131 = vector.shape_cast %130 : vector<32xf32> to vector<32x1xf32>
    %cst_85 = arith.constant 3.906250e-03 : f32
    %132 = vector.broadcast %cst_85 : f32 to vector<32x1xf32>
    %133 = arith.mulf %131, %132 : vector<32x1xf32>
    %c0_86 = arith.constant 0 : index
    %c0_87 = arith.constant 0 : index
    %134 = vector.load %arg6[%c0_86, %c0_87] : memref<32x32xf32, #tpu.memory_space<vmem>>, vector<32x32xf32>
    %cst_88 = arith.constant dense<0.000000e+00> : vector<32x1xf32>
    %135 = tpu.matmul %134, %133, %cst_88 {dimension_numbers = #tpu.dot_dimension_numbers<[1], [0], [0], [1], [0, 0, 1, 1], [], []>} : vector<32x32xf32>, vector<32x1xf32>, vector<32x1xf32> -> vector<32x1xf32>
    %136 = vector.broadcast %135 : vector<32x1xf32> to vector<32x256xf32>
    %137 = arith.subf %129, %136 : vector<32x256xf32>
    %138 = arith.mulf %137, %137 : vector<32x256xf32>
    %cst_89 = arith.constant dense<0.000000e+00> : vector<32xf32>
    %139 = vector.multi_reduction <add>, %138, %cst_89 [1] : vector<32x256xf32> to vector<32xf32>
    %140 = vector.shape_cast %139 : vector<32xf32> to vector<32x1xf32>
    %cst_90 = arith.constant 3.906250e-03 : f32
    %141 = vector.broadcast %cst_90 : f32 to vector<32x1xf32>
    %142 = arith.mulf %140, %141 : vector<32x1xf32>
    %c0_91 = arith.constant 0 : index
    %c0_92 = arith.constant 0 : index
    %143 = vector.load %arg6[%c0_91, %c0_92] : memref<32x32xf32, #tpu.memory_space<vmem>>, vector<32x32xf32>
    %cst_93 = arith.constant dense<0.000000e+00> : vector<32x1xf32>
    %144 = tpu.matmul %143, %142, %cst_93 {dimension_numbers = #tpu.dot_dimension_numbers<[1], [0], [0], [1], [0, 0, 1, 1], [], []>} : vector<32x32xf32>, vector<32x1xf32>, vector<32x1xf32> -> vector<32x1xf32>
    %cst_94 = arith.constant 9.99999974E-6 : f32
    %145 = vector.broadcast %cst_94 : f32 to vector<32x1xf32>
    %146 = arith.addf %144, %145 : vector<32x1xf32>
    %147 = math.rsqrt %146 : vector<32x1xf32>
    %148 = vector.broadcast %147 : vector<32x1xf32> to vector<32x256xf32>
    %149 = arith.mulf %137, %148 : vector<32x256xf32>
    %150 = vector.broadcast %84 : vector<32x1xf32> to vector<32x256xf32>
    %151 = arith.mulf %149, %150 : vector<32x256xf32>
    %152 = vector.broadcast %85 : vector<32x1xf32> to vector<32x256xf32>
    %153 = arith.addf %151, %152 : vector<32x256xf32>
    %c0_95 = arith.constant 0 : index
    %c0_96 = arith.constant 0 : index
    %154 = vector.load %arg7[%c0_95, %c0_96] : memref<32x8xf32, #tpu.memory_space<vmem>>, vector<32x8xf32>
    %c1_97 = arith.constant 1 : index
    %c0_98 = arith.constant 0 : index
    %c0_99 = arith.constant 0 : index
    %155 = vector.load %arg2[%c1_97, %c0_98, %c0_99] : memref<2x1x8xf32, #tpu.memory_space<vmem>>, vector<1x1x8xf32>
    %156 = vector.shape_cast %155 : vector<1x1x8xf32> to vector<1x8xf32>
    %157 = vector.broadcast %156 : vector<1x8xf32> to vector<32x8xf32>
    %158 = arith.mulf %154, %157 : vector<32x8xf32>
    %cst_100 = arith.constant dense<0.000000e+00> : vector<32xf32>
    %159 = vector.multi_reduction <add>, %158, %cst_100 [1] : vector<32x8xf32> to vector<32xf32>
    %160 = vector.shape_cast %159 : vector<32xf32> to vector<32x1xf32>
    %161 = vector.broadcast %160 : vector<32x1xf32> to vector<32x256xf32>
    %162 = arith.addf %153, %161 : vector<32x256xf32>
    %163 = arith.negf %162 : vector<32x256xf32>
    %164 = math.exp %163 : vector<32x256xf32>
    %cst_101 = arith.constant 1.000000e+00 : f32
    %165 = vector.broadcast %cst_101 : f32 to vector<32x256xf32>
    %166 = arith.addf %165, %164 : vector<32x256xf32>
    %167 = arith.divf %165, %166 : vector<32x256xf32>
    %168 = arith.mulf %162, %167 : vector<32x256xf32>
    %c1_102 = arith.constant 1 : index
    %c0_103 = arith.constant 0 : index
    %c0_104 = arith.constant 0 : index
    %169 = vector.load %arg10[%c1_102, %c0_103, %c0_104] : memref<2x32x256xf32, #tpu.memory_space<vmem>>, vector<1x32x256xf32>
    %170 = vector.shape_cast %169 : vector<1x32x256xf32> to vector<32x256xf32>
    %171 = vector.shape_cast %168 : vector<32x256xf32> to vector<1x32x256xf32>
    tpu.vector_store %arg10[%c1_102, %c0_103, %c0_104], %171 {strides = array<i32>} : memref<2x32x256xf32, #tpu.memory_space<vmem>>, vector<1x32x256xf32>,
    return
  }
  func.func @transform_0(%arg0: i32) -> (i32, i32, i32) {
    %c0_i32 = arith.constant 0 : i32
    %c0_i32_0 = arith.constant 0 : i32
    %c0_i32_1 = arith.constant 0 : i32
    return %arg0, %c0_i32, %c0_i32_0 : i32, i32, i32
  }
  func.func @transform_1(%arg0: i32) -> (i32, i32, i32) {
    %c0_i32 = arith.constant 0 : i32
    %c0_i32_0 = arith.constant 0 : i32
    %c0_i32_1 = arith.constant 0 : i32
    return %arg0, %c0_i32, %c0_i32_0 : i32, i32, i32
  }
  func.func @transform_2(%arg0: i32) -> (i32, i32) {
    %c0_i32 = arith.constant 0 : i32
    %c0_i32_0 = arith.constant 0 : i32
    %c0_i32_1 = arith.constant 0 : i32
    return %c0_i32, %c0_i32_0 : i32, i32
  }
  func.func @transform_3(%arg0: i32) -> (i32, i32) {
    %c0_i32 = arith.constant 0 : i32
    %c0_i32_0 = arith.constant 0 : i32
    %c0_i32_1 = arith.constant 0 : i32
    return %c0_i32, %c0_i32_0 : i32, i32
  }
  func.func @transform_4(%arg0: i32) -> (i32, i32) {
    %c0_i32 = arith.constant 0 : i32
    %c0_i32_0 = arith.constant 0 : i32
    %c0_i32_1 = arith.constant 0 : i32
    return %c0_i32, %c0_i32_0 : i32, i32
  }
  func.func @transform_5(%arg0: i32) -> (i32, i32) {
    %c0_i32 = arith.constant 0 : i32
    %c0_i32_0 = arith.constant 0 : i32
    %c0_i32_1 = arith.constant 0 : i32
    return %c0_i32, %c0_i32_0 : i32, i32
  }
  func.func @transform_6(%arg0: i32) -> (i32, i32) {
    %c0_i32 = arith.constant 0 : i32
    %c0_i32_0 = arith.constant 0 : i32
    %c0_i32_1 = arith.constant 0 : i32
    return %c0_i32, %c0_i32_0 : i32, i32
  }
  func.func @transform_7(%arg0: i32) -> (i32, i32) {
    %c0_i32 = arith.constant 0 : i32
    %c0_i32_0 = arith.constant 0 : i32
    %c0_i32_1 = arith.constant 0 : i32
    return %c0_i32, %c0_i32_0 : i32, i32
  }
  func.func @transform_8(%arg0: i32) -> (i32, i32) {
    %c0_i32 = arith.constant 0 : i32
    %c0_i32_0 = arith.constant 0 : i32
    %c0_i32_1 = arith.constant 0 : i32
    return %c0_i32, %c0_i32_0 : i32, i32
  }
  func.func @transform_9(%arg0: i32) -> (i32, i32, i32) {
    %c0_i32 = arith.constant 0 : i32
    %c0_i32_0 = arith.constant 0 : i32
    %c0_i32_1 = arith.constant 0 : i32
    return %arg0, %c0_i32, %c0_i32_0 : i32, i32, i32
  }
}

</mosaic_0001>

<bundles_post_ra>
// kernel: ws_block_extdata.1
= control target key start
LH: loop header
LB: loop body
LE: loop exit
PB: predicated region body
PF: predicated region fallthrough
CT: control target
= control target key end

     0   :  { %v36_v0 = vlaneseq  ;;  %v1891_v1 = vmov 0.0   ;;  %s1892_s13 = smov 17   ;;  %s1893_s14 = smov 15   ;;  %vm65_vm0 = vcmask 138240   ;;  %vm120_vm1 = vcmask 121856   ;;  %s2660_s2 = inlined_call_operand.vmem [shape: f32[9,256], index: 2, kind: input, shape index: {}]   ;;  %s2661_s0 = inlined_call_operand.vmem [shape: f32[2,8,256], index: 0, kind: input, shape index: {}]   ;;  %s2662_s4 = inlined_call_operand.vmem [shape: f32[32,1], index: 4, kind: input, shape index: {}]   ;;  %s2663_s3 = inlined_call_operand.vmem [shape: f32[32,72], index: 3, kind: input, shape index: {}]   ;;  %s2664_s5 = inlined_call_operand.vmem [shape: f32[32,32], index: 5, kind: input, shape index: {}]   ;;  %s2665_s1 = inlined_call_operand.vmem [shape: f32[2,1,8], index: 1, kind: input, shape index: {}]   ;;  %s2666_s6 = inlined_call_operand.vmem [shape: f32[32,8], index: 6, kind: input, shape index: {}]   ;;  %s2667_s7 = inlined_call_operand.vmem [shape: f32[32,1], index: 7, kind: input, shape index: {}]   ;;  %s2668_s8 = inlined_call_operand.vmem [shape: f32[32,1], index: 8, kind: input, shape index: {}]   ;;  %s2669_s9 = inlined_call_operand.vmem [shape: f32[2,32,256], index: 9, kind: output, shape index: {}]  }
   0x1   :  { %676 = vmatprep.mubr.f32.mxu0 %v1891_v1  ;;  %765 = vmatprep.mubr.f32.mxu1 %v1891_v1  ;;  %v1652_v3 = vld [vmem:[%s2660_s2 + $0x10] ss:$8 sm:$0x3]  ;;  %v1651_v4 = vld [vmem:[%s2660_s2 + $0x6] ss:$8 sm:$0x3] }
   0x2   :  { %v37_v2 = vshrl.u32 %v36_v0, 7  ;;  %v1650_v11 = vld [vmem:[%s2660_s2 + $0x5] ss:$8 sm:$0x3]  ;;  %s1894_s19 = smov 1   ;;  %s1895_s24 = smov 127  }
   0x3   :  { %v1659_v14 = vld [vmem:[%s2660_s2 + $0x10] ss:$8 sm:$0x3]  ;;  %v1649_v17 = vld [vmem:[%s2660_s2 + $0x3] ss:$8 sm:$0x3] }
   0x4   :  { %v1959_v5 = vsub.s32 0, %v37_v2  ;;  %v1961_v6 = vsub.s32 1, %v37_v2  ;;  %v1648_v20 = vld [vmem:[%s2660_s2 + $0x2] ss:$8 sm:$0x3]  ;;  %s1896_s27 = smov 113  }
   0x5   :  { %v1658_v23 = vld [vmem:[%s2660_s2 + $0x6] ss:$8 sm:$0x3]  ;;  %v1657_v26 = vld [vmem:[%s2660_s2 + $0x5] ss:$8 sm:$0x3] }
   0x6   :  { %v261_v7 = vrot.slane %v1652_v3, %v1959_v5  ;;  %v211_v8 = vrot.slane %v1651_v4, %v1959_v5  ;;  %v265_v9 = vrot.slane %v1652_v3, %v1961_v6  ;;  %v215_v10 = vrot.slane %v1651_v4, %v1961_v6  ;;  %v34_v29 = vld [vmem:[%s2660_s2] ss:$8 sm:$0x3]  ;;  %v1656_v32 = vld [vmem:[%s2660_s2 + $0x3] ss:$8 sm:$0x3] }
   0x7   :  { %v178_v12 = vrot.slane %v1650_v11, %v1961_v6  ;;  %v174_v13 = vrot.slane %v1650_v11, %v1959_v5  ;;  %v508_v15 = vrot.slane %v1659_v14, %v1961_v6  ;;  %v504_v16 = vrot.slane %v1659_v14, %v1959_v5  ;;  %s1897_s15 = smov 111   ;;  %v1655_v35 = vld [vmem:[%s2660_s2 + $0x2] ss:$8 sm:$0x3]  ;;  %s1898_s23 = smov 112   ;;  %v2059_v43 = vld [vmem:[%s2661_s0 + $0x18] sm:$0xff] }
   0x8   :  { %266 = vrot.lane.b32.xlu0 %v261_v7, %s1892_s13  ;;  %216 = vrot.lane.b32.xlu1 %v211_v8, %s1893_s14  ;;  %v137_v18 = vrot.slane %v1649_v17, %v1961_v6  ;;  %v133_v19 = vrot.slane %v1649_v17, %v1959_v5  ;;  %v98_v21 = vrot.slane %v1648_v20, %v1961_v6  ;;  %v295_v38 = vld [vmem:[%s2660_s2] ss:$8 sm:$0x3]  ;;  %s1899_s26 = smov 16   ;;  %v2067_v44 = vld [vmem:[%s2661_s0 + $0x10] sm:$0xff]  ;;  %vm159_vm2 = vcmask 7168  }
   0x9   :  { %v94_v22 = vrot.slane %v1648_v20, %v1959_v5  ;;  %v462_v24 = vrot.slane %v1658_v23, %v1961_v6  ;;  %v458_v25 = vrot.slane %v1658_v23, %v1959_v5  ;;  %v426_v27 = vrot.slane %v1657_v26, %v1961_v6  ;;  %v2044_v41 = vld [vmem:[%s2661_s0 + $0x8] sm:$0xff]  ;;  %v2051_v42 = vld [vmem:[%s2661_s0] sm:$0xff] }
   0xa   :  { %v422_v28 = vrot.slane %v1657_v26, %v1959_v5  ;;  %v43_v30 = vrot.slane %v34_v29, %v1961_v6  ;;  %v39_v31 = vrot.slane %v34_v29, %v1959_v5  ;;  %v388_v33 = vrot.slane %v1656_v32, %v1961_v6 }
   0xb   :  { %v384_v34 = vrot.slane %v1656_v32, %v1959_v5  ;;  %v352_v36 = vrot.slane %v1655_v35, %v1961_v6  ;;  %v348_v37 = vrot.slane %v1655_v35, %v1959_v5  ;;  %v304_v39 = vrot.slane %v295_v38, %v1961_v6 }
   0xc   :  { %268 = vrot.lane.b32.xlu0 %v265_v9, %s1892_s13  ;;  %218 = vrot.lane.b32.xlu1 %v215_v10, %s1893_s14  ;;  %v300_v40 = vrot.slane %v295_v38, %v1959_v5  ;;  %vm103_vm3 = vcmask 924672   ;;  %vm142_vm4 = vcmask 1039360   ;;  %vm48_vm5 = vcmask 908288  }
   0xd   :  { %vm248_vm6 = vcmask 916480   ;;  %vm81_vm7 = vcmask 130048   ;;  %vm599_vm8 = vcmask 588800   ;;  %vm818_vm9 = vcmask 261120  }
   0xe   :  { %vm1156_vm10 = vcmask 64512  }
  0x10   :  { %181 = vrot.lane.b32.xlu1 %v178_v12, %s1894_s19  ;;  %179 = vrot.lane.b32.xlu0 %v174_v13, %s1894_s19 }
  0x14   :  { %511 = vrot.lane.b32.xlu1 %v508_v15, %s1892_s13  ;;  %509 = vrot.lane.b32.xlu0 %v504_v16, %s1892_s13 }
  0x18   :  { %140 = vrot.lane.b32.xlu1 %v137_v18, %s1895_s24  ;;  %138 = vrot.lane.b32.xlu0 %v133_v19, %s1895_s24 }
  0x1c   :  { %101 = vrot.lane.b32.xlu1 %v98_v21, %s1896_s27  ;;  %99 = vrot.lane.b32.xlu0 %v94_v22, %s1896_s27 }
  0x20   :  { %465 = vrot.lane.b32.xlu1 %v462_v24, %s1893_s14  ;;  %463 = vrot.lane.b32.xlu0 %v458_v25, %s1893_s14 }
  0x24   :  { %429 = vrot.lane.b32.xlu1 %v426_v27, %s1894_s19  ;;  %427 = vrot.lane.b32.xlu0 %v422_v28, %s1894_s19 }
  0x28   :  { %46 = vrot.lane.b32.xlu1 %v43_v30, %s1897_s15  ;;  %44 = vrot.lane.b32.xlu0 %v39_v31, %s1897_s15 }
  0x2c   :  { %391 = vrot.lane.b32.xlu1 %v388_v33, %s1895_s24  ;;  %389 = vrot.lane.b32.xlu0 %v384_v34, %s1895_s24 }
  0x30   :  { %355 = vrot.lane.b32.xlu1 %v352_v36, %s1896_s27  ;;  %353 = vrot.lane.b32.xlu0 %v348_v37, %s1896_s27 }
  0x34   :  { %307 = vrot.lane.b32.xlu1 %v304_v39, %s1897_s15  ;;  %305 = vrot.lane.b32.xlu0 %v300_v40, %s1897_s15 }
  0x38   :  { %244 = vrot.lane.b32.xlu1 %v2044_v41, %s1898_s23  ;;  %246 = vrot.lane.b32.xlu0 %v1891_v1, %s1898_s23 }
  0x3c   :  { %242 = vrot.lane.b32.xlu1 %v2051_v42, %s1898_s23  ;;  %77 = vrot.lane.b32.xlu0 %v2051_v42, %s1899_s26 }
  0x40   :  { %491 = vrot.lane.b32.xlu1 %v2059_v43, %s1898_s23  ;;  %75 = vrot.lane.b32.xlu0 %v1891_v1, %s1899_s26 }
  0x44   :  { %489 = vrot.lane.b32.xlu1 %v2067_v44, %s1898_s23 }
  0x48   :  { %79 = vrot.lane.b32.xlu1 %v2044_v41, %s1899_s26 }
  0x7a   :  { %v267_v45 = vpop.permute.xlu0 %266  ;;  %v217_v46 = vpop.permute.xlu1 %216 }
  0x7b   :  { %v274_v47 = vmul.f32 %v267_v45, %v2051_v42  ;;  %v224_v50 = vmul.f32 %v217_v46, %v2051_v42 }
  0x7d   :  { %280 = vrot.lane.b32.xlu0 %v274_v47, %s1897_s15 }
  0x7e   :  { %v269_v48 = vpop.permute.xlu0 %268  ;;  %v219_v49 = vpop.permute.xlu1 %218 }
  0x7f   :  { %v276_v51 = vmul.f32 0.0, %v269_v48  ;;  %v226_v54 = vmul.f32 0.0, %v219_v49  ;;  %v270_v19 = vsel %vm65_vm0, %v267_v45, %v269_v48  ;;  %v220_v22 = vsel %vm120_vm1, %v217_v46, %v219_v49 }
  0x80   :  { %v275_v21 = vmul.f32 %v270_v19, %v2044_v41  ;;  %v225_v26 = vmul.f32 %v220_v22, %v2044_v41 }
  0x81   :  { %284 = vrot.lane.b32.xlu1 %v276_v51, %s1897_s15  ;;  %230 = vrot.lane.b32.xlu0 %v224_v50, %s1896_s27 }
  0x82   :  { %v2077_v52 = vpop.permute.xlu1 %181  ;;  %v2079_v53 = vpop.permute.xlu0 %179 }
  0x83   :  { %v189_v55 = vmul.f32 0.0, %v2077_v52  ;;  %v187_v58 = vmul.f32 %v2079_v53, %v2051_v42  ;;  %v183_v30 = vsel %vm159_vm2, %v2079_v53, %v2077_v52 }
  0x84   :  { %v188_v32 = vmul.f32 %v183_v30, %v2044_v41 }
  0x85   :  { %234 = vrot.lane.b32.xlu1 %v226_v54, %s1896_s27  ;;  %197 = vrot.lane.b32.xlu0 %v189_v55, %s1895_s24 }
  0x86   :  { %v512_v56 = vpop.permute.xlu1 %511  ;;  %v510_v57 = vpop.permute.xlu0 %509 }
  0x87   :  { %v517_v59 = vmul.f32 %v2067_v44, %v510_v57  ;;  %v519_v62 = vmul.f32 0.0, %v512_v56  ;;  %v513_v27 = vsel %vm65_vm0, %v510_v57, %v512_v56 }
  0x88   :  { %v518_v29 = vmul.f32 %v2059_v43, %v513_v27 }
  0x89   :  { %523 = vrot.lane.b32.xlu0 %v517_v59, %s1897_s15  ;;  %193 = vrot.lane.b32.xlu1 %v187_v58, %s1895_s24  ;;  %v1900_v58 = vmov 0   ;;  %v578_v59 = vld [vmem:[%s2662_s4 + $0x18] sm:$0xff] }
  0x8a   :  { %v141_v60 = vpop.permute.xlu1 %140  ;;  %v139_v61 = vpop.permute.xlu0 %138  ;;  %1809 = vset.pattern.permute.xlu0 %v1900_v58  ;;  %1810 = vset.pattern.permute.xlu1 %v1900_v58 }
  0x8b   :  { %v149_v63 = vmul.f32 %v141_v60, %v2044_v41  ;;  %v147_v3 = vmul.f32 0.0, %v139_v61  ;;  %v143_v34 = vsel %vm142_vm4, %v139_v61, %v141_v60  ;;  %v577_v60 = vld [vmem:[%s2662_s4 + $0x10] sm:$0xff]  ;;  %v575_v61 = vld [vmem:[%s2662_s4] sm:$0xff] }
  0x8c   :  { %v148_v37 = vmul.f32 %v143_v34, %v2051_v42 }
  0x8d   :  { %157 = vrot.lane.b32.xlu0 %v149_v63, %s1894_s19  ;;  %527 = vrot.lane.b32.xlu1 %v519_v62, %s1897_s15  ;;  %v576_v62 = vld [vmem:[%s2662_s4 + $0x8] sm:$0xff] }
  0x8e   :  { %v102_v0 = vpop.permute.xlu1 %101  ;;  %v100_v2 = vpop.permute.xlu0 %99 }
  0x8f   :  { %v110_v4 = vmul.f32 %v102_v0, %v2044_v41  ;;  %v108_v7 = vmul.f32 0.0, %v100_v2  ;;  %v104_v31 = vsel %vm103_vm3, %v100_v2, %v102_v0 }
  0x90   :  { %v109_v33 = vmul.f32 %v104_v31, %v2051_v42 }
  0x91   :  { %153 = vrot.lane.b32.xlu0 %v147_v3, %s1894_s19  ;;  %118 = vrot.lane.b32.xlu1 %v110_v4, %s1893_s14 }
  0x92   :  { %v466_v5 = vpop.permute.xlu1 %465  ;;  %v464_v6 = vpop.permute.xlu0 %463 }
  0x93   :  { %v473_v8 = vmul.f32 0.0, %v466_v5  ;;  %v471_v11 = vmul.f32 %v2067_v44, %v464_v6  ;;  %v467_v35 = vsel %vm120_vm1, %v464_v6, %v466_v5 }
  0x94   :  { %v472_v38 = vmul.f32 %v2059_v43, %v467_v35 }
  0x95   :  { %114 = vrot.lane.b32.xlu0 %v108_v7, %s1893_s14  ;;  %481 = vrot.lane.b32.xlu1 %v473_v8, %s1896_s27 }
  0x96   :  { %v430_v9 = vpop.permute.xlu1 %429  ;;  %v428_v10 = vpop.permute.xlu0 %427 }
  0x97   :  { %v437_v14 = vmul.f32 0.0, %v430_v9  ;;  %v435_v17 = vmul.f32 %v2067_v44, %v428_v10  ;;  %v431_v39 = vsel %vm159_vm2, %v428_v10, %v430_v9 }
  0x98   :  { %v436_v46 = vmul.f32 %v2059_v43, %v431_v39 }
  0x99   :  { %477 = vrot.lane.b32.xlu1 %v471_v11, %s1896_s27 }
  0x9a   :  { %v47_v12 = vpop.permute.xlu1 %46  ;;  %v45_v13 = vpop.permute.xlu0 %44 }
  0x9b   :  { %v53_v15 = vmul.f32 0.0, %v45_v13  ;;  %v55_v20 = vmul.f32 %v47_v12, %v2044_v41  ;;  %v49_v49 = vsel %vm48_vm5, %v45_v13, %v47_v12 }
  0x9c   :  { %v54_v51 = vmul.f32 %v49_v49, %v2051_v42 }
  0x9d   :  { %59 = vrot.lane.b32.xlu0 %v53_v15, %s1892_s13  ;;  %445 = vrot.lane.b32.xlu1 %v437_v14, %s1895_s24 }
  0x9e   :  { %v392_v16 = vpop.permute.xlu1 %391  ;;  %v390_v23 = vpop.permute.xlu0 %389 }
  0x9f   :  { %v399_v18 = vmul.f32 %v2059_v43, %v392_v16  ;;  %v397_v24 = vmul.f32 0.0, %v390_v23  ;;  %v393_v40 = vsel %vm142_vm4, %v390_v23, %v392_v16 }
  0xa0   :  { %v398_v45 = vmul.f32 %v2067_v44, %v393_v40 }
  0xa1   :  { %407 = vrot.lane.b32.xlu0 %v399_v18, %s1894_s19  ;;  %441 = vrot.lane.b32.xlu1 %v435_v17, %s1895_s24 }
  0xa2   :  { %v356_v25 = vpop.permute.xlu1 %355  ;;  %v354_v36 = vpop.permute.xlu0 %353 }
  0xa3   :  { %v363_v28 = vmul.f32 %v2059_v43, %v356_v25  ;;  %v357_v52 = vsel %vm103_vm3, %v354_v36, %v356_v25  ;;  %v361_v56 = vmul.f32 0.0, %v354_v36 }
  0xa4   :  { %v362_v54 = vmul.f32 %v2067_v44, %v357_v52 }
  0xa5   :  { %282 = vrot.lane.b32.xlu0 %v275_v21, %s1897_s15  ;;  %63 = vrot.lane.b32.xlu1 %v55_v20, %s1892_s13 }
  0xa6   :  { %v308_v47 = vpop.permute.xlu1 %307  ;;  %v306_v48 = vpop.permute.xlu0 %305 }
  0xa7   :  { %v309_v50 = vsel %vm48_vm5, %v306_v48, %v308_v47  ;;  %v313_v55 = vmul.f32 0.0, %v306_v48  ;;  %v315_v57 = vmul.f32 %v2059_v43, %v308_v47 }
  0xa8   :  { %v314_v53 = vmul.f32 %v2067_v44, %v309_v50 }
  0xa9   :  { %232 = vrot.lane.b32.xlu0 %v225_v26, %s1896_s27  ;;  %403 = vrot.lane.b32.xlu1 %v397_v24, %s1894_s19 }
  0xaa   :  { %v245_v63 = vpop.permute.xlu1 %244  ;;  %v247_v2 = vpop.permute.xlu0 %246 }
  0xab   :  { %v250_v30 = vsel %vm248_vm6, %v245_v63, %v247_v2 }
  0xad   :  { %525 = vrot.lane.b32.xlu0 %v518_v29, %s1897_s15  ;;  %371 = vrot.lane.b32.xlu1 %v363_v28, %s1893_s14 }
  0xae   :  { %v243_v0 = vpop.permute.xlu1 %242  ;;  %v2168_v4 = vpop.permute.xlu0 %77 }
  0xb1   :  { %195 = vrot.lane.b32.xlu1 %v188_v32, %s1895_s24  ;;  %116 = vrot.lane.b32.xlu0 %v109_v33, %s1893_s14  ;;  %v249_v33 = vsel %vm248_vm6, %v243_v0, %v245_v63 }
  0xb2   :  { %v492_v3 = vpop.permute.xlu1 %491  ;;  %v2170_v6 = vpop.permute.xlu0 %75 }
  0xb3   :  { %v494_v40 = vsel %vm248_vm6, %v492_v3, %v247_v2 }
  0xb5   :  { %155 = vrot.lane.b32.xlu1 %v148_v37, %s1894_s19  ;;  %479 = vrot.lane.b32.xlu0 %v472_v38, %s1896_s27 }
  0xb6   :  { %v490_v5 = vpop.permute.xlu1 %489 }
  0xb7   :  { %v493_v47 = vsel %vm248_vm6, %v490_v5, %v492_v3  ;;  %v535_v3 = vld [vmem:[%s2663_s3] sm:$0xff] }
  0xb9   :  { %405 = vrot.lane.b32.xlu1 %v398_v45, %s1894_s19  ;;  %443 = vrot.lane.b32.xlu0 %v436_v46, %s1895_s24 }
  0xba   :  { %v2172_v7 = vpop.permute.xlu1 %79 }
  0xbd   :  { %333 = vrot.lane.b32.xlu1 %v2067_v44, %s1899_s26  ;;  %61 = vrot.lane.b32.xlu0 %v54_v51, %s1892_s13 }
  0xc1   :  { %369 = vrot.lane.b32.xlu0 %v362_v54, %s1893_s14  ;;  %321 = vrot.lane.b32.xlu1 %v314_v53, %s1892_s13 }
  0xc5   :  { %367 = vrot.lane.b32.xlu0 %v361_v56, %s1893_s14  ;;  %319 = vrot.lane.b32.xlu1 %v313_v55, %s1892_s13 }
  0xc9   :  { %335 = vrot.lane.b32.xlu0 %v2059_v43, %s1899_s26  ;;  %591 = vperm.xlu1 %1810, %v577_v60  }
  0xcd   :  { %323 = vrot.lane.b32.xlu0 %v315_v57, %s1892_s13  ;;  %586 = vperm.xlu1 %1810, %v576_v62  }
  0xd1   :  { %596 = vperm.xlu0 %1809, %v578_v59  }
  0xd5   :  { %581 = vperm.xlu0 %1809, %v575_v61   ;;  %v82_v61 = vsel %vm81_vm7, %v2170_v6, %v2168_v4 }
  0xef   :  { %v281_v8 = vpop.permute.xlu0 %280 }
  0xf3   :  { %v285_v9 = vpop.permute.xlu1 %284  ;;  %v231_v10 = vpop.permute.xlu0 %230 }
  0xf7   :  { %v235_v11 = vpop.permute.xlu1 %234  ;;  %v198_v12 = vpop.permute.xlu0 %197 }
  0xfb   :  { %v524_v13 = vpop.permute.xlu0 %523  ;;  %v194_v14 = vpop.permute.xlu1 %193 }
  0xff   :  { %v158_v15 = vpop.permute.xlu0 %157  ;;  %v528_v16 = vpop.permute.xlu1 %527 }
 0x103   :  { %v119_v17 = vpop.permute.xlu1 %118  ;;  %v154_v18 = vpop.permute.xlu0 %153 }
 0x107   :  { %v482_v19 = vpop.permute.xlu1 %481  ;;  %v115_v20 = vpop.permute.xlu0 %114 }
 0x10b   :  { %v478_v21 = vpop.permute.xlu1 %477 }
 0x10f   :  { %v2174_v22 = vpop.permute.xlu0 %59  ;;  %v446_v23 = vpop.permute.xlu1 %445 }
 0x113   :  { %v2176_v24 = vpop.permute.xlu0 %407  ;;  %v442_v25 = vpop.permute.xlu1 %441 }
 0x117   :  { %v283_v26 = vpop.permute.xlu0 %282  ;;  %v2178_v27 = vpop.permute.xlu1 %63 }
 0x118   :  { %v287_v28 = vsel %vm48_vm5, %v283_v26, %v285_v9  ;;  %v286_v29 = vsel %vm48_vm5, %v281_v8, %v283_v26 }
 0x119   :  { %626 = vmatprep.subr.mxu0 %v287_v28 }
 0x11a   :  { %627 = vmatpush1.msra.mxu0 %v286_v29 }
 0x11b   :  { %628 = vmatprep.subr.mxu0 %v250_v30  ;;  %v233_v31 = vpop.permute.xlu0 %232  ;;  %v404_v32 = vpop.permute.xlu1 %403 }
 0x11c   :  { %629 = vmatpush1.msra.mxu0 %v249_v33  ;;  %v237_v34 = vsel %vm103_vm3, %v233_v31, %v235_v11  ;;  %v236_v35 = vsel %vm103_vm3, %v231_v10, %v233_v31  ;;  %v537_v11 = vld [vmem:[%s2663_s3 + $0x10] sm:$0xff] }
 0x11d   :  { %630 = vmatprep.subr.mxu0 %v237_v34 }
 0x11e   :  { %631 = vmatpush1.msra.mxu0 %v236_v35 }
 0x11f   :  { %v526_v36 = vpop.permute.xlu0 %525  ;;  %v372_v37 = vpop.permute.xlu1 %371 }
 0x120   :  { %v530_v38 = vsel %vm48_vm5, %v526_v36, %v528_v16  ;;  %v529_v39 = vsel %vm48_vm5, %v524_v13, %v526_v36 }
 0x121   :  { %715 = vmatprep.subr.mxu1 %v530_v38 }
 0x122   :  { %716 = vmatpush1.msra.mxu1 %v529_v39 }
 0x123   :  { %717 = vmatprep.subr.mxu1 %v494_v40  ;;  %v196_v45 = vpop.permute.xlu1 %195  ;;  %v117_v46 = vpop.permute.xlu0 %116 }
 0x124   :  { %718 = vmatpush1.msra.mxu1 %v493_v47  ;;  %v200_v48 = vsel %vm142_vm4, %v196_v45, %v198_v12  ;;  %v199_v49 = vsel %vm142_vm4, %v194_v14, %v196_v45  ;;  %v122_v56 = vsel %vm120_vm1, %v117_v46, %v119_v17  ;;  %v121_v57 = vsel %vm120_vm1, %v115_v20, %v117_v46  ;;  %v538_v14 = vld [vmem:[%s2663_s3 + $0x18] sm:$0xff] }
 0x125   :  { %632 = vmatprep.subr.mxu0 %v200_v48 }
 0x126   :  { %633 = vmatpush1.msra.mxu0 %v199_v49 }
 0x127   :  { %634 = vmatprep.subr.mxu0 %v2044_v41  ;;  %v156_v50 = vpop.permute.xlu1 %155  ;;  %v480_v51 = vpop.permute.xlu0 %479 }
 0x128   :  { %635 = vmatpush1.msra.mxu0 %v2051_v42  ;;  %v161_v52 = vsel %vm159_vm2, %v156_v50, %v158_v15  ;;  %v484_v53 = vsel %vm103_vm3, %v480_v51, %v482_v19  ;;  %v160_v54 = vsel %vm159_vm2, %v154_v18, %v156_v50  ;;  %v483_v55 = vsel %vm103_vm3, %v478_v21, %v480_v51 }
 0x129   :  { %636 = vmatprep.subr.mxu0 %v161_v52  ;;  %719 = vmatprep.subr.mxu1 %v484_v53  ;;  %v83_v42 = vsel %vm81_vm7, %v2168_v4, %v2172_v7  ;;  %v536_v7 = vld [vmem:[%s2663_s3 + $0x8] sm:$0xff] }
 0x12a   :  { %637 = vmatpush1.msra.mxu0 %v160_v54  ;;  %720 = vmatpush1.msra.mxu1 %v483_v55 }
 0x12b   :  { %638 = vmatprep.subr.mxu0 %v122_v56  ;;  %v444_v41 = vpop.permute.xlu0 %443  ;;  %v406_v60 = vpop.permute.xlu1 %405 }
 0x12c   :  { %639 = vmatpush1.msra.mxu0 %v121_v57  ;;  %v448_v58 = vsel %vm142_vm4, %v444_v41, %v446_v23  ;;  %v447_v59 = vsel %vm142_vm4, %v442_v25, %v444_v41  ;;  %v410_v0 = vsel %vm159_vm2, %v406_v60, %v2176_v24 }
 0x12d   :  { %640 = vmatprep.subr.mxu0 %v83_v42  ;;  %721 = vmatprep.subr.mxu1 %v448_v58 }
 0x12e   :  { %641 = vmatpush1.msra.mxu0 %v82_v61  ;;  %722 = vmatpush1.msra.mxu1 %v447_v59 }
 0x12f   :  { %723 = vmatprep.subr.mxu1 %v2059_v43  ;;  %v62_v62 = vpop.permute.xlu0 %61  ;;  %v409_v43 = vsel %vm159_vm2, %v404_v32, %v406_v60  ;;  %v334_v4 = vpop.permute.xlu1 %333 }
 0x130   :  { %724 = vmatpush1.msra.mxu1 %v2067_v44  ;;  %v67_v63 = vsel %vm65_vm0, %v62_v62, %v2178_v27  ;;  %v66_v2 = vsel %vm65_vm0, %v2174_v22, %v62_v62  ;;  %v337_v15 = vsel %vm81_vm7, %v2170_v6, %v334_v4 }
 0x131   :  { %642 = vmatprep.subr.mxu0 %v67_v63  ;;  %725 = vmatprep.subr.mxu1 %v410_v0  ;;  %v2301_v0 = vld [vmem:[%s2664_s5] sm:$0xff] }
 0x132   :  { %643 = vmatpush1.msra.mxu0 %v66_v2  ;;  %726 = vmatpush1.msra.mxu1 %v409_v43 }
 0x133   :  { %1660 = vmatmul.mubr.msk.f32.vlgmr.msra.gmra.mxu0 %vm599_vm8, %v535_v3  ;;  %v370_v44 = vpop.permute.xlu0 %369  ;;  %v322_v9 = vpop.permute.xlu1 %321 }
 0x134   :  { %v374_v5 = vsel %vm120_vm1, %v370_v44, %v372_v37  ;;  %682 = vmatprep.mubr.f32.mxu0 %v1891_v1 }
 0x135   :  { %727 = vmatprep.subr.mxu1 %v374_v5 }
 0x137   :  { %1661 = vmatmul.mubr.msk.f32.gmra.mxu0 %vm599_vm8, %v536_v7  ;;  %v368_v8 = vpop.permute.xlu0 %367  ;;  %v320_v16 = vpop.permute.xlu1 %319 }
 0x138   :  { %v373_v10 = vsel %vm120_vm1, %v368_v8, %v370_v44  ;;  %688 = vmatprep.mubr.f32.mxu0 %v1891_v1  ;;  %v325_v19 = vsel %vm65_vm0, %v320_v16, %v322_v9 }
 0x139   :  { %728 = vmatpush1.msra.mxu1 %v373_v10  ;;  %v2315_v10 = vld [vmem:[%s2664_s5 + $0x10] sm:$0xff] }
 0x13b   :  { %1662 = vmatmul.mubr.msk.f32.gmra.mxu0 %vm599_vm8, %v537_v11  ;;  %v336_v12 = vpop.permute.xlu0 %335 }
 0x13c   :  { %v338_v13 = vsel %vm81_vm7, %v334_v4, %v336_v12  ;;  %694 = vmatprep.mubr.f32.mxu0 %v1891_v1 }
 0x13d   :  { %729 = vmatprep.subr.mxu1 %v338_v13 }
 0x13e   :  { %730 = vmatpush1.msra.mxu1 %v337_v15 }
 0x13f   :  { %1663 = vmatmul.mubr.msk.f32.gmra.mxu0 %vm599_vm8, %v538_v14  ;;  %v324_v17 = vpop.permute.xlu0 %323 }
 0x140   :  { %v326_v18 = vsel %vm65_vm0, %v322_v9, %v324_v17  ;;  %1751 = vmatprep.mubr.msk.f32.mxu0 %vm818_vm9, %v2301_v0  ;;  %v2310_v9 = vld [vmem:[%s2664_s5 + $0x8] sm:$0xff] }
 0x141   :  { %731 = vmatprep.subr.mxu1 %v326_v18 }
 0x142   :  { %732 = vmatpush1.msra.mxu1 %v325_v19 }
 0x143   :  { %1664 = vmatmul.mubr.msk.f32.vlgmr.msra.gmra.mxu1 %vm599_vm8, %v535_v3 }
 0x144   :  { %771 = vmatprep.mubr.f32.mxu1 %v1891_v1  ;;  %v592_v21 = vpop.permute.xlu1 %591 }
 0x147   :  { %1665 = vmatmul.mubr.msk.f32.gmra.mxu1 %vm599_vm8, %v536_v7 }
 0x148   :  { %777 = vmatprep.mubr.f32.mxu1 %v1891_v1  ;;  %v587_v27 = vpop.permute.xlu1 %586 }
 0x14b   :  { %1666 = vmatmul.mubr.msk.f32.gmra.mxu1 %vm599_vm8, %v537_v11  ;;  %v2324_v11 = vld [vmem:[%s2664_s5 + $0x18] sm:$0xff] }
 0x14c   :  { %783 = vmatprep.mubr.f32.mxu1 %v1891_v1  ;;  %v597_v24 = vpop.permute.xlu0 %596 }
 0x14f   :  { %1667 = vmatmul.mubr.msk.f32.gmra.mxu1 %vm599_vm8, %v538_v14 }
 0x150   :  { %v582_v34 = vpop.permute.xlu0 %581  ;;  %1765 = vmatprep.mubr.msk.f32.mxu1 %vm818_vm9, %v2301_v0 }
 0x1f3   :  { %v678_v6 = vpop.f32.mrf.mxu0 }
 0x1f4   :  { %v2270_v45 = vadd.f32 %v678_v6, %v582_v34 }
 0x1f5   :  { %v680_v20 = vpop.f32.mrf.mxu0 }
 0x1f6   :  { %v2264_v38 = vadd.f32 %v680_v20, %v582_v34 }
 0x1f7   :  { %v684_v22 = vpop.f32.mrf.mxu0 }
 0x1f8   :  { %v2254_v31 = vadd.f32 %v684_v22, %v587_v27  ;;  %v798_v48 = vadd.f32 %v2264_v38, %v2270_v45 }
 0x1f9   :  { %v686_v23 = vpop.f32.mrf.mxu0 }
 0x1fa   :  { %v2256_v32 = vadd.f32 %v686_v23, %v587_v27 }
 0x1fb   :  { %v690_v25 = vpop.f32.mrf.mxu0 }
 0x1fc   :  { %v2250_v26 = vadd.f32 %v690_v25, %v592_v21  ;;  %v801_v39 = vadd.f32 %v2256_v32, %v2254_v31 }
 0x1fd   :  { %v692_v28 = vpop.f32.mrf.mxu0 }
 0x1fe   :  { %v2252_v29 = vadd.f32 %v692_v28, %v592_v21 }
 0x1ff   :  { %v696_v30 = vpop.f32.mrf.mxu0 }
 0x200   :  { %v2258_v1 = vadd.f32 %v696_v30, %v597_v24  ;;  %v804_v33 = vadd.f32 %v2252_v29, %v2250_v26 }
 0x201   :  { %v698_v35 = vpop.f32.mrf.mxu0 }
 0x202   :  { %v2262_v36 = vadd.f32 %v698_v35, %v597_v24  ;;  %805 = vadd.xlane.f32.xlu0 %v804_v33 }
 0x203   :  { %v767_v37 = vpop.f32.mrf.mxu1 }
 0x204   :  { %v807_v40 = vadd.f32 %v2262_v36, %v2258_v1  ;;  %v2282_v57 = vadd.f32 %v767_v37, %v582_v34 }
 0x205   :  { %v769_v46 = vpop.f32.mrf.mxu1 }
 0x206   :  { %802 = vadd.xlane.f32.xlu0 %v801_v39  ;;  %808 = vadd.xlane.f32.xlu1 %v807_v40  ;;  %v2278_v55 = vadd.f32 %v769_v46, %v582_v34 }
 0x207   :  { %v773_v47 = vpop.f32.mrf.mxu1 }
 0x208   :  { %v1241_v61 = vadd.f32 %v2278_v55, %v2282_v57  ;;  %v2294_v62 = vadd.f32 %v773_v47, %v587_v27 }
 0x209   :  { %v775_v49 = vpop.f32.mrf.mxu1 }
 0x20a   :  { %799 = vadd.xlane.f32.xlu1 %v798_v48  ;;  %v2288_v59 = vadd.f32 %v775_v49, %v587_v27 }
 0x20b   :  { %v779_v50 = vpop.f32.mrf.mxu1 }
 0x20c   :  { %v2274_v52 = vadd.f32 %v779_v50, %v592_v21  ;;  %v1244_v63 = vadd.f32 %v2288_v59, %v2294_v62 }
 0x20d   :  { %v781_v51 = vpop.f32.mrf.mxu1 }
 0x20e   :  { %v2276_v53 = vadd.f32 %v781_v51, %v592_v21 }
 0x20f   :  { %v785_v54 = vpop.f32.mrf.mxu1 }
 0x210   :  { %v1247_v56 = vadd.f32 %v2276_v53, %v2274_v52  ;;  %v2284_v42 = vadd.f32 %v785_v54, %v597_v24 }
 0x211   :  { %v787_v41 = vpop.f32.mrf.mxu1 }
 0x212   :  { %v2286_v58 = vadd.f32 %v787_v41, %v597_v24  ;;  %1248 = vadd.xlane.f32.xlu1 %v1247_v56 }
 0x214   :  { %v1250_v60 = vadd.f32 %v2286_v58, %v2284_v42 }
 0x216   :  { %1251 = vadd.xlane.f32.xlu0 %v1250_v60  ;;  %1242 = vadd.xlane.f32.xlu1 %v1241_v61 }
 0x21a   :  { %1245 = vadd.xlane.f32.xlu0 %v1244_v63 }
 0x28b   :  { %v806_v2 = vpop.xlane.xlu0 %805 }
 0x28c   :  { %v812_v4 = vmul.f32 0.00390625, %v806_v2 }
 0x28f   :  { %v809_v3 = vpop.xlane.xlu1 %808  ;;  %v803_v44 = vpop.xlane.xlu0 %802 }
 0x290   :  { %v813_v43 = vmul.f32 0.00390625, %v809_v3  ;;  %v811_v7 = vmul.f32 0.00390625, %v803_v44 }
 0x292   :  { %1743 = vmatprep.subr.mxu0 %v813_v43 }
 0x293   :  { %1744 = vmatpush3.msra.mxu0 %v813_v43  ;;  %v800_v5 = vpop.xlane.xlu1 %799 }
 0x294   :  { %1745 = vmatprep.subr.mxu0 %v812_v4  ;;  %v810_v8 = vmul.f32 0.00390625, %v800_v5 }
 0x295   :  { %1746 = vmatpush3.msra.mxu0 %v812_v4 }
 0x296   :  { %1747 = vmatprep.subr.mxu0 %v811_v7 }
 0x297   :  { %1748 = vmatpush3.msra.mxu0 %v811_v7  ;;  %v1676_v7 = vld [vmem:[%s2665_s1] ss:$0 sm:$0xff] }
 0x298   :  { %1749 = vmatprep.subr.mxu0 %v810_v8 }
 0x299   :  { %1750 = vmatpush3.msra.mxu0 %v810_v8 }
 0x29a   :  { %1752 = vmatmul.mubr.msk.f32.vlgmr.msra.gmra.mxu0 %vm818_vm9, %v2310_v9 }
 0x29b   :  { %1754 = vmatprep.mubr.msk.f32.mxu0 %vm818_vm9, %v2315_v10  ;;  %v1249_v12 = vpop.xlane.xlu1 %1248 }
 0x29c   :  { %v1255_v15 = vmul.f32 0.00390625, %v1249_v12 }
 0x29e   :  { %1755 = vmatmul.mubr.msk.f32.gmra.mxu0 %vm818_vm9, %v2324_v11 }
 0x29f   :  { %v1252_v13 = vpop.xlane.xlu0 %1251  ;;  %1779 = vmatprep.mubr.msk.f32.mxu0 %vm818_vm9, %v2301_v0  ;;  %v1243_v16 = vpop.xlane.xlu1 %1242 }
 0x2a0   :  { %v1256_v14 = vmul.f32 0.00390625, %v1252_v13  ;;  %v1253_v19 = vmul.f32 0.00390625, %v1243_v16 }
 0x2a2   :  { %1771 = vmatprep.subr.mxu0 %v1256_v14 }
 0x2a3   :  { %1772 = vmatpush3.msra.mxu0 %v1256_v14  ;;  %v1246_v17 = vpop.xlane.xlu0 %1245 }
 0x2a4   :  { %v1254_v18 = vmul.f32 0.00390625, %v1246_v17  ;;  %1773 = vmatprep.subr.mxu0 %v1255_v15  ;;  %v1141_v17 = vld [vmem:[%s2666_s6] sm:$0xff] }
 0x2a5   :  { %1774 = vmatpush3.msra.mxu0 %v1255_v15 }
 0x2a6   :  { %1775 = vmatprep.subr.mxu0 %v1254_v18 }
 0x2a7   :  { %1776 = vmatpush3.msra.mxu0 %v1254_v18 }
 0x2a8   :  { %1777 = vmatprep.subr.mxu0 %v1253_v19 }
 0x2a9   :  { %1778 = vmatpush3.msra.mxu0 %v1253_v19  ;;  %v1143_v19 = vld [vmem:[%s2666_s6 + $0x10] sm:$0xff] }
 0x2aa   :  { %1780 = vmatmul.mubr.msk.f32.vlgmr.msra.gmra.mxu0 %vm818_vm9, %v2310_v9 }
 0x2ab   :  { %1782 = vmatprep.mubr.msk.f32.mxu0 %vm818_vm9, %v2315_v10 }
 0x2ae   :  { %1783 = vmatmul.mubr.msk.f32.gmra.mxu0 %vm818_vm9, %v2324_v11 }
 0x35a   :  { %v1753_v6 = vpop.f32.mrf.mxu0 }
 0x35c   :  { %v897_v20 = vpop.f32.mrf.mxu0 }
 0x35e   :  { %v1756_v21 = vpop.f32.mrf.mxu0 }
 0x35f   :  { %933 = vperm.xlu0 %1809, %v1756_v21  }
 0x360   :  { %v907_v22 = vpop.f32.mrf.mxu0 }
 0x361   :  { %928 = vperm.xlu1 %1810, %v907_v22   ;;  %v1154_v22 = vmul.f32 %v1676_v7, %v1143_v19 }
 0x363   :  { %918 = vperm.xlu0 %1809, %v897_v20   ;;  %v1152_v20 = vmul.f32 %v1676_v7, %v1141_v17 }
 0x365   :  { %923 = vperm.xlu1 %1810, %v1753_v6  }
 0x36a   :  { %v1781_v23 = vpop.f32.mrf.mxu0 }
 0x36c   :  { %v1339_v24 = vpop.f32.mrf.mxu0 }
 0x36e   :  { %v1784_v25 = vpop.f32.mrf.mxu0 }
 0x36f   :  { %1375 = vperm.xlu1 %1810, %v1784_v25   ;;  %v1157_v25 = vsel %vm1156_vm10, %v1152_v20, 0.0 }
 0x370   :  { %v1349_v27 = vpop.f32.mrf.mxu0 }
 0x371   :  { %1370 = vperm.xlu0 %1809, %v1349_v27  }
 0x373   :  { %1365 = vperm.xlu1 %1810, %v1781_v23   ;;  %v1144_v23 = vld [vmem:[%s2666_s6 + $0x18] sm:$0xff] }
 0x374   :  { %v1155_v27 = vmul.f32 %v1676_v7, %v1144_v23 }
 0x375   :  { %1360 = vperm.xlu0 %1809, %v1339_v24   ;;  %v1694_v24 = vld [vmem:[%s2665_s1 + $0x1] ss:$0 sm:$0xff] }
 0x3da   :  { %v934_v28 = vpop.permute.xlu0 %933 }
 0x3db   :  { %v2337_v30 = vsub.f32 %v2258_v1, %v934_v28  ;;  %v2340_v33 = vsub.f32 %v2262_v36, %v934_v28  ;;  %v1163_v28 = vsel %vm1156_vm10, %v1154_v22, 0.0 }
 0x3dc   :  { %v929_v34 = vpop.permute.xlu1 %928 }
 0x3dd   :  { %v2343_v35 = vsub.f32 %v2250_v26, %v929_v34  ;;  %v2346_v37 = vsub.f32 %v2252_v29, %v929_v34  ;;  %v950_v39 = vmul.f32 %v2337_v30, %v2337_v30  ;;  %v951_v40 = vmul.f32 %v2340_v33, %v2340_v33 }
 0x3de   :  { %v919_v46 = vpop.permute.xlu0 %918  ;;  %v1555_v34 = vmul.f32 %v1694_v24, %v1141_v17 }
 0x3df   :  { %v2353_v1 = vsub.f32 %v2270_v45, %v919_v46  ;;  %v2356_v36 = vsub.f32 %v2264_v38, %v919_v46  ;;  %v961_v47 = vadd.f32 %v951_v40, %v950_v39  ;;  %v948_v26 = vmul.f32 %v2343_v35, %v2343_v35 }
 0x3e0   :  { %v924_v48 = vpop.permute.xlu1 %923  ;;  %v949_v29 = vmul.f32 %v2346_v37, %v2346_v37  ;;  %v1166_v39 = vsel %vm1156_vm10, %v1155_v27, 0.0  ;;  %v1559_v46 = vsel %vm1156_vm10, %v1555_v34, 0.0 }
 0x3e1   :  { %v2363_v49 = vsub.f32 %v2254_v31, %v924_v48  ;;  %v2366_v50 = vsub.f32 %v2256_v32, %v924_v48  ;;  %962 = vadd.xlane.f32.xlu1 %v961_v47  ;;  %v944_v45 = vmul.f32 %v2353_v1, %v2353_v1  ;;  %v945_v38 = vmul.f32 %v2356_v36, %v2356_v36 }
 0x3e2   :  { %v958_v51 = vadd.f32 %v949_v29, %v948_v26  ;;  %v1557_v47 = vmul.f32 %v1694_v24, %v1143_v19  ;;  %v1558_v48 = vmul.f32 %v1694_v24, %v1144_v23 }
 0x3e3   :  { %v952_v54 = vadd.f32 %v945_v38, %v944_v45  ;;  %v946_v56 = vmul.f32 %v2363_v49, %v2363_v49  ;;  %v947_v41 = vmul.f32 %v2366_v50, %v2366_v50  ;;  %v790_v38 = vld [vmem:[%s2667_s7] sm:$0xff] }
 0x3e4   :  { %959 = vadd.xlane.f32.xlu0 %v958_v51  ;;  %v1565_v29 = vsel %vm1156_vm10, %v1557_v47, 0.0  ;;  %v1568_v45 = vsel %vm1156_vm10, %v1558_v48, 0.0  ;;  %v791_v51 = vld [vmem:[%s2667_s7 + $0x8] sm:$0xff] }
 0x3e5   :  { %953 = vadd.xlane.f32.xlu1 %v952_v54  ;;  %v955_v31 = vadd.f32 %v947_v41, %v946_v56  ;;  %v792_v54 = vld [vmem:[%s2667_s7 + $0x10] sm:$0xff]  ;;  %v793_v56 = vld [vmem:[%s2667_s7 + $0x18] sm:$0xff]  ;;  %v794_v41 = vld [vmem:[%s2668_s8] sm:$0xff] }
 0x3e8   :  { %956 = vadd.xlane.f32.xlu0 %v955_v31  ;;  %v795_v31 = vld [vmem:[%s2668_s8 + $0x8] sm:$0xff] }
 0x3ea   :  { %v1376_v32 = vpop.permute.xlu1 %1375 }
 0x3eb   :  { %v2377_v60 = vsub.f32 %v2284_v42, %v1376_v32  ;;  %v2380_v61 = vsub.f32 %v2286_v58, %v1376_v32  ;;  %v796_v32 = vld [vmem:[%s2668_s8 + $0x10] sm:$0xff] }
 0x3ec   :  { %v1371_v63 = vpop.permute.xlu0 %1370 }
 0x3ed   :  { %v2383_v2 = vsub.f32 %v2274_v52, %v1371_v63  ;;  %v2386_v3 = vsub.f32 %v2276_v53, %v1371_v63  ;;  %v1392_v43 = vmul.f32 %v2377_v60, %v2377_v60  ;;  %v1393_v44 = vmul.f32 %v2380_v61, %v2380_v61  ;;  %v1142_v53 = vld [vmem:[%s2666_s6 + $0x8] sm:$0xff]  ;;  %v797_v63 = vld [vmem:[%s2668_s8 + $0x18] sm:$0xff] }
 0x3ee   :  { %v1366_v4 = vpop.permute.xlu1 %1365  ;;  %v1153_v16 = vmul.f32 %v1676_v7, %v1142_v53  ;;  %v1556_v40 = vmul.f32 %v1694_v24, %v1142_v53 }
 0x3ef   :  { %v2393_v42 = vsub.f32 %v2294_v62, %v1366_v4  ;;  %v2396_v58 = vsub.f32 %v2288_v59, %v1366_v4  ;;  %v1403_v5 = vadd.f32 %v1393_v44, %v1392_v43  ;;  %v1390_v52 = vmul.f32 %v2383_v2, %v2383_v2 }
 0x3f0   :  { %v1361_v8 = vpop.permute.xlu0 %1360  ;;  %v1391_v62 = vmul.f32 %v2386_v3, %v2386_v3  ;;  %v1160_v21 = vsel %vm1156_vm10, %v1153_v16, 0.0  ;;  %v1562_v26 = vsel %vm1156_vm10, %v1556_v40, 0.0 }
 0x3f1   :  { %v2409_v12 = vsub.f32 %v2282_v57, %v1361_v8  ;;  %v2412_v59 = vsub.f32 %v2278_v55, %v1361_v8  ;;  %1404 = vadd.xlane.f32.xlu0 %v1403_v5  ;;  %v1388_v13 = vmul.f32 %v2393_v42, %v2393_v42  ;;  %v1389_v14 = vmul.f32 %v2396_v58, %v2396_v58 }
 0x3f2   :  { %v1400_v15 = vadd.f32 %v1391_v62, %v1390_v52 }
 0x3f3   :  { %v1397_v18 = vadd.f32 %v1389_v14, %v1388_v13  ;;  %v1386_v57 = vmul.f32 %v2409_v12, %v2409_v12  ;;  %v1387_v55 = vmul.f32 %v2412_v59, %v2412_v59 }
 0x3f4   :  { %1401 = vadd.xlane.f32.xlu1 %v1400_v15 }
 0x3f5   :  { %1398 = vadd.xlane.f32.xlu0 %v1397_v18  ;;  %v1394_v6 = vadd.f32 %v1387_v55, %v1386_v57 }
 0x3f8   :  { %1395 = vadd.xlane.f32.xlu1 %v1394_v6 }
 0x3f9   :  { %1161 = vadd.xlane.f32.xlu0 %v1160_v21 }
 0x3fc   :  { %1158 = vadd.xlane.f32.xlu1 %v1157_v25 }
 0x3fd   :  { %1164 = vadd.xlane.f32.xlu0 %v1163_v28 }
 0x400   :  { %1167 = vadd.xlane.f32.xlu1 %v1166_v39 }
 0x401   :  { %1560 = vadd.xlane.f32.xlu0 %v1559_v46 }
 0x404   :  { %1563 = vadd.xlane.f32.xlu1 %v1562_v26 }
 0x405   :  { %1566 = vadd.xlane.f32.xlu0 %v1565_v29 }
 0x408   :  { %1569 = vadd.xlane.f32.xlu1 %v1568_v45 }
 0x419   :  { %1087 = vperm.xlu1 %1810, %v790_v38  }
 0x41b   :  { %1092 = vperm.xlu0 %1809, %v791_v51  }
 0x41d   :  { %1097 = vperm.xlu1 %1810, %v792_v54  }
 0x41f   :  { %1102 = vperm.xlu0 %1809, %v793_v56  }
 0x421   :  { %1115 = vperm.xlu1 %1810, %v794_v41  }
 0x423   :  { %1120 = vperm.xlu0 %1809, %v795_v31  }
 0x425   :  { %1125 = vperm.xlu1 %1810, %v796_v32  }
 0x427   :  { %1130 = vperm.xlu0 %1809, %v797_v63  }
 0x46a   :  { %v963_v43 = vpop.xlane.xlu1 %962 }
 0x46b   :  { %v967_v44 = vmul.f32 0.00390625, %v963_v43 }
 0x46d   :  { %v960_v4 = vpop.xlane.xlu0 %959  ;;  %1757 = vmatprep.subr.mxu1 %v967_v44 }
 0x46e   :  { %v966_v5 = vmul.f32 0.00390625, %v960_v4  ;;  %1758 = vmatpush3.msra.mxu1 %v967_v44  ;;  %v954_v52 = vpop.xlane.xlu1 %953 }
 0x46f   :  { %v964_v8 = vmul.f32 0.00390625, %v954_v52 }
 0x470   :  { %1759 = vmatprep.subr.mxu1 %v966_v5 }
 0x471   :  { %1760 = vmatpush3.msra.mxu1 %v966_v5  ;;  %v957_v53 = vpop.xlane.xlu0 %956 }
 0x472   :  { %v965_v7 = vmul.f32 0.00390625, %v957_v53 }
 0x474   :  { %1761 = vmatprep.subr.mxu1 %v965_v7 }
 0x475   :  { %1762 = vmatpush3.msra.mxu1 %v965_v7 }
 0x476   :  { %1763 = vmatprep.subr.mxu1 %v964_v8 }
 0x477   :  { %1764 = vmatpush3.msra.mxu1 %v964_v8 }
 0x478   :  { %1766 = vmatmul.mubr.msk.f32.vlgmr.msra.gmra.mxu1 %vm818_vm9, %v2310_v9 }
 0x479   :  { %1768 = vmatprep.mubr.msk.f32.mxu1 %vm818_vm9, %v2315_v10 }
 0x47a   :  { %v1405_v62 = vpop.xlane.xlu0 %1404 }
 0x47b   :  { %v1409_v13 = vmul.f32 0.00390625, %v1405_v62 }
 0x47c   :  { %1769 = vmatmul.mubr.msk.f32.gmra.mxu1 %vm818_vm9, %v2324_v11 }
 0x47d   :  { %v1402_v14 = vpop.xlane.xlu1 %1401  ;;  %1785 = vmatprep.subr.mxu1 %v1409_v13  ;;  %1793 = vmatprep.mubr.msk.f32.mxu1 %vm818_vm9, %v2301_v0 }
 0x47e   :  { %v1408_v15 = vmul.f32 0.00390625, %v1402_v14  ;;  %1786 = vmatpush3.msra.mxu1 %v1409_v13  ;;  %v1399_v16 = vpop.xlane.xlu0 %1398 }
 0x47f   :  { %v1407_v17 = vmul.f32 0.00390625, %v1399_v16 }
 0x480   :  { %1787 = vmatprep.subr.mxu1 %v1408_v15 }
 0x481   :  { %v1396_v18 = vpop.xlane.xlu1 %1395  ;;  %1788 = vmatpush3.msra.mxu1 %v1408_v15 }
 0x482   :  { %v1406_v57 = vmul.f32 0.00390625, %v1396_v18  ;;  %1789 = vmatprep.subr.mxu1 %v1407_v17  ;;  %v1162_v51 = vpop.xlane.xlu0 %1161 }
 0x483   :  { %1790 = vmatpush3.msra.mxu1 %v1407_v17 }
 0x484   :  { %1791 = vmatprep.subr.mxu1 %v1406_v57 }
 0x485   :  { %1792 = vmatpush3.msra.mxu1 %v1406_v57  ;;  %v1159_v38 = vpop.xlane.xlu1 %1158 }
 0x486   :  { %1794 = vmatmul.mubr.msk.f32.vlgmr.msra.gmra.mxu1 %vm818_vm9, %v2310_v9  ;;  %v1165_v56 = vpop.xlane.xlu0 %1164 }
 0x487   :  { %1796 = vmatprep.mubr.msk.f32.mxu1 %vm818_vm9, %v2315_v10 }
 0x489   :  { %v1168_v54 = vpop.xlane.xlu1 %1167 }
 0x48a   :  { %1797 = vmatmul.mubr.msk.f32.gmra.mxu1 %vm818_vm9, %v2324_v11  ;;  %v2482_v31 = vpop.xlane.xlu0 %1560 }
 0x48d   :  { %v2480_v41 = vpop.xlane.xlu1 %1563 }
 0x48e   :  { %v2486_v63 = vpop.xlane.xlu0 %1566 }
 0x491   :  { %v2484_v32 = vpop.xlane.xlu1 %1569 }
 0x495   :  { %v2488_v43 = vpop.permute.xlu1 %1087 }
 0x496   :  { %v1093_v44 = vpop.permute.xlu0 %1092 }
 0x499   :  { %v2490_v4 = vpop.permute.xlu1 %1097 }
 0x49a   :  { %v2492_v5 = vpop.permute.xlu0 %1102 }
 0x49d   :  { %v2494_v52 = vpop.permute.xlu1 %1115 }
 0x49e   :  { %v1121_v53 = vpop.permute.xlu0 %1120 }
 0x4a1   :  { %v2496_v7 = vpop.permute.xlu1 %1125 }
 0x4a2   :  { %v2498_v8 = vpop.permute.xlu0 %1130 }
 0x538   :  { %v1767_v0 = vpop.f32.mrf.mxu1 }
 0x539   :  { %v1040_v55 = vadd.f32 1e-05, %v1767_v0 }
 0x53a   :  { %v1034_v19 = vpop.f32.mrf.mxu1 }
 0x53b   :  { %1811 = vrsqrt.f32 %v1040_v55  ;;  %v1035_v6 = vadd.f32 1e-05, %v1034_v19 }
 0x53c   :  { %v1770_v20 = vpop.f32.mrf.mxu1 }
 0x53d   :  { %1813 = vrsqrt.f32 %v1035_v6  ;;  %v1050_v21 = vadd.f32 1e-05, %v1770_v20 }
 0x53e   :  { %v1044_v22 = vpop.f32.mrf.mxu1 }
 0x53f   :  { %1815 = vrsqrt.f32 %v1050_v21  ;;  %v1045_v23 = vadd.f32 1e-05, %v1044_v22 }
 0x541   :  { %1817 = vrsqrt.f32 %v1045_v23 }
 0x546   :  { %v1795_v24 = vpop.f32.mrf.mxu1 }
 0x547   :  { %v1482_v9 = vadd.f32 1e-05, %v1795_v24 }
 0x548   :  { %v1812_v25 = vpop.eup %1811  ;;  %v1476_v27 = vpop.f32.mrf.mxu1 }
 0x549   :  { %1819 = vrsqrt.f32 %v1482_v9  ;;  %v1477_v10 = vadd.f32 1e-05, %v1476_v27  ;;  %1064 = vperm.xlu1 %1810, %v1812_v25  }
 0x54a   :  { %v1814_v11 = vpop.eup %1813  ;;  %v1798_v28 = vpop.f32.mrf.mxu1 }
 0x54b   :  { %1821 = vrsqrt.f32 %v1477_v10  ;;  %v1492_v34 = vadd.f32 1e-05, %v1798_v28  ;;  %1059 = vperm.xlu0 %1809, %v1814_v11  }
 0x54c   :  { %v1816_v39 = vpop.eup %1815  ;;  %v1486_v40 = vpop.f32.mrf.mxu1 }
 0x54d   :  { %v1487_v46 = vadd.f32 1e-05, %v1486_v40  ;;  %1823 = vrsqrt.f32 %v1492_v34 }
 0x54e   :  { %v1818_v47 = vpop.eup %1817 }
 0x54f   :  { %1825 = vrsqrt.f32 %v1487_v46  ;;  %1069 = vperm.xlu1 %1810, %v1818_v47   ;;  %1074 = vperm.xlu0 %1809, %v1816_v39  }
 0x556   :  { %v1820_v26 = vpop.eup %1819 }
 0x557   :  { %1506 = vperm.xlu1 %1810, %v1820_v26  }
 0x558   :  { %v1822_v48 = vpop.eup %1821 }
 0x559   :  { %1501 = vperm.xlu0 %1809, %v1822_v48  }
 0x55a   :  { %v1824_v29 = vpop.eup %1823 }
 0x55c   :  { %v1826_v45 = vpop.eup %1825 }
 0x55d   :  { %1511 = vperm.xlu1 %1810, %v1826_v45   ;;  %1516 = vperm.xlu0 %1809, %v1824_v29  }
 0x5c4   :  { %v1065_v62 = vpop.permute.xlu1 %1064 }
 0x5c5   :  { %v1079_v13 = vmul.f32 %v1065_v62, %v2363_v49  ;;  %v1080_v14 = vmul.f32 %v1065_v62, %v2366_v50 }
 0x5c6   :  { %v1060_v15 = vpop.permute.xlu0 %1059 }
 0x5c7   :  { %v1107_v16 = vmul.f32 %v1093_v44, %v1079_v13  ;;  %v1108_v17 = vmul.f32 %v1093_v44, %v1080_v14  ;;  %v1077_v18 = vmul.f32 %v1060_v15, %v2353_v1  ;;  %v1078_v57 = vmul.f32 %v1060_v15, %v2356_v36 }
 0x5c9   :  { %v1135_v0 = vadd.f32 %v1121_v53, %v1107_v16  ;;  %v1136_v55 = vadd.f32 %v1121_v53, %v1108_v17  ;;  %v1105_v19 = vmul.f32 %v2488_v43, %v1077_v18  ;;  %v1106_v6 = vmul.f32 %v2488_v43, %v1078_v57 }
 0x5ca   :  { %v1070_v20 = vpop.permute.xlu1 %1069  ;;  %v1075_v21 = vpop.permute.xlu0 %1074 }
 0x5cb   :  { %v2506_v22 = vadd.f32 %v1162_v51, %v1135_v0  ;;  %v2508_v49 = vadd.f32 %v1162_v51, %v1136_v55  ;;  %v1133_v50 = vadd.f32 %v2494_v52, %v1105_v19  ;;  %v1134_v23 = vadd.f32 %v2494_v52, %v1106_v6 }
 0x5cc   :  { %v1081_v1 = vmul.f32 %v1070_v20, %v2343_v35  ;;  %v1082_v36 = vmul.f32 %v1070_v20, %v2346_v37  ;;  %v1083_v24 = vmul.f32 %v1075_v21, %v2337_v30  ;;  %v1084_v9 = vmul.f32 %v1075_v21, %v2340_v33 }
 0x5cd   :  { %v1679_v25 = vmul.f32 -1.442695, %v2506_v22  ;;  %v1680_v27 = vmul.f32 -1.442695, %v2508_v49  ;;  %v2518_v10 = vadd.f32 %v1159_v38, %v1133_v50  ;;  %v2520_v11 = vadd.f32 %v1159_v38, %v1134_v23 }
 0x5ce   :  { %v1109_v28 = vmul.f32 %v2490_v4, %v1081_v1  ;;  %v1110_v34 = vmul.f32 %v2490_v4, %v1082_v36  ;;  %v1111_v35 = vmul.f32 %v2492_v5, %v1083_v24  ;;  %v1112_v37 = vmul.f32 %v2492_v5, %v1084_v9 }
 0x5cf   :  { %1827 = vpow2.f32 %v1679_v25  ;;  %v1677_v30 = vmul.f32 -1.442695, %v2518_v10  ;;  %v1678_v33 = vmul.f32 -1.442695, %v2520_v11 }
 0x5d0   :  { %1829 = vpow2.f32 %v1680_v27  ;;  %v1137_v39 = vadd.f32 %v2496_v7, %v1109_v28  ;;  %v1138_v40 = vadd.f32 %v2496_v7, %v1110_v34  ;;  %v1139_v46 = vadd.f32 %v2498_v8, %v1111_v35 }
 0x5d1   :  { %1831 = vpow2.f32 %v1677_v30  ;;  %v1140_v47 = vadd.f32 %v2498_v8, %v1112_v37 }
 0x5d2   :  { %1833 = vpow2.f32 %v1678_v33  ;;  %v2532_v26 = vadd.f32 %v1165_v56, %v1137_v39  ;;  %v2534_v48 = vadd.f32 %v1165_v56, %v1138_v40  ;;  %v2536_v29 = vadd.f32 %v1168_v54, %v1139_v46  ;;  %v1507_v45 = vpop.permute.xlu1 %1506 }
 0x5d3   :  { %v2538_v38 = vadd.f32 %v1168_v54, %v1140_v47  ;;  %v1521_v51 = vmul.f32 %v1507_v45, %v2393_v42  ;;  %v1522_v62 = vmul.f32 %v1507_v45, %v2396_v58 }
 0x5d4   :  { %v1681_v13 = vmul.f32 -1.442695, %v2532_v26  ;;  %v1682_v14 = vmul.f32 -1.442695, %v2534_v48  ;;  %v1683_v15 = vmul.f32 -1.442695, %v2536_v29  ;;  %v1502_v16 = vpop.permute.xlu0 %1501 }
 0x5d5   :  { %v1684_v17 = vmul.f32 -1.442695, %v2538_v38  ;;  %v1529_v56 = vmul.f32 %v1521_v51, %v1093_v44  ;;  %v1530_v18 = vmul.f32 %v1522_v62, %v1093_v44  ;;  %v1519_v57 = vmul.f32 %v1502_v16, %v2409_v12 }
 0x5d6   :  { %1835 = vpow2.f32 %v1681_v13  ;;  %v1520_v54 = vmul.f32 %v1502_v16, %v2412_v59 }
 0x5d7   :  { %1837 = vpow2.f32 %v1682_v14  ;;  %v1537_v42 = vadd.f32 %v1529_v56, %v1121_v53  ;;  %v1538_v0 = vadd.f32 %v1530_v18, %v1121_v53  ;;  %v1527_v58 = vmul.f32 %v1519_v57, %v2488_v43 }
 0x5d8   :  { %1839 = vpow2.f32 %v1683_v15  ;;  %v1528_v55 = vmul.f32 %v1520_v54, %v2488_v43  ;;  %v1512_v19 = vpop.permute.xlu1 %1511  ;;  %v1517_v6 = vpop.permute.xlu0 %1516 }
 0x5d9   :  { %1841 = vpow2.f32 %v1684_v17  ;;  %v2551_v20 = vadd.f32 %v2480_v41, %v1537_v42  ;;  %v2554_v44 = vadd.f32 %v2480_v41, %v1538_v0  ;;  %v1535_v12 = vadd.f32 %v1527_v58, %v2494_v52 }
 0x5da   :  { %v1536_v59 = vadd.f32 %v1528_v55, %v2494_v52  ;;  %v1523_v53 = vmul.f32 %v1512_v19, %v2383_v2  ;;  %v1524_v21 = vmul.f32 %v1512_v19, %v2386_v3  ;;  %v1525_v50 = vmul.f32 %v1517_v6, %v2377_v60 }
 0x5db   :  { %v1697_v43 = vmul.f32 -1.442695, %v2551_v20  ;;  %v1698_v23 = vmul.f32 -1.442695, %v2554_v44  ;;  %v2564_v1 = vadd.f32 %v2482_v31, %v1535_v12  ;;  %v1526_v41 = vmul.f32 %v1517_v6, %v2380_v61 }
 0x5dc   :  { %v1828_v36 = vpop.eup %1827  ;;  %v2568_v24 = vadd.f32 %v2482_v31, %v1536_v59  ;;  %v1531_v52 = vmul.f32 %v1523_v53, %v2490_v4  ;;  %v1532_v2 = vmul.f32 %v1524_v21, %v2490_v4  ;;  %v1533_v3 = vmul.f32 %v1525_v50, %v2492_v5 }
 0x5dd   :  { %v1830_v60 = vpop.eup %1829  ;;  %v1203_v9 = vadd.f32 1.0, %v1828_v36  ;;  %1843 = vpow2.f32 %v1697_v43  ;;  %v1695_v25 = vmul.f32 -1.442695, %v2564_v1  ;;  %v1534_v27 = vmul.f32 %v1526_v41, %v2492_v5 }
 0x5de   :  { %v1832_v28 = vpop.eup %1831  ;;  %v1204_v34 = vadd.f32 1.0, %v1830_v60  ;;  %1845 = vpow2.f32 %v1698_v23  ;;  %v1696_v61 = vmul.f32 -1.442695, %v2568_v24  ;;  %v1539_v31 = vadd.f32 %v1531_v52, %v2496_v7 }
 0x5df   :  { %v1834_v35 = vpop.eup %1833  ;;  %1847 = vrcp.f32 %v1203_v9  ;;  %v1201_v37 = vadd.f32 1.0, %v1832_v28  ;;  %v1540_v4 = vadd.f32 %v1532_v2, %v2496_v7  ;;  %v1541_v30 = vadd.f32 %v1533_v3, %v2498_v8 }
 0x5e0   :  { %1849 = vrcp.f32 %v1204_v34  ;;  %v1202_v33 = vadd.f32 1.0, %v1834_v35  ;;  %v2580_v39 = vadd.f32 %v2486_v63, %v1539_v31  ;;  %v1542_v5 = vadd.f32 %v1534_v27, %v2498_v8 }
 0x5e1   :  { %1851 = vrcp.f32 %v1201_v37  ;;  %v2584_v40 = vadd.f32 %v2486_v63, %v1540_v4  ;;  %v2588_v7 = vadd.f32 %v2484_v32, %v1541_v30 }
 0x5e2   :  { %1853 = vrcp.f32 %v1202_v33  ;;  %v1699_v46 = vmul.f32 -1.442695, %v2580_v39  ;;  %v2591_v62 = vadd.f32 %v2484_v32, %v1542_v5 }
 0x5e3   :  { %v1836_v47 = vpop.eup %1835  ;;  %1855 = vpow2.f32 %v1695_v25  ;;  %v1700_v15 = vmul.f32 -1.442695, %v2584_v40  ;;  %v1701_v17 = vmul.f32 -1.442695, %v2588_v7 }
 0x5e4   :  { %v1838_v45 = vpop.eup %1837  ;;  %v1205_v51 = vadd.f32 1.0, %v1836_v47  ;;  %1857 = vpow2.f32 %v1696_v61  ;;  %v1702_v56 = vmul.f32 -1.442695, %v2591_v62 }
 0x5e5   :  { %v1840_v13 = vpop.eup %1839  ;;  %v1206_v8 = vadd.f32 1.0, %v1838_v45  ;;  %1859 = vpow2.f32 %v1699_v46 }
 0x5e6   :  { %v1842_v14 = vpop.eup %1841  ;;  %1861 = vrcp.f32 %v1205_v51  ;;  %v1207_v63 = vadd.f32 1.0, %v1840_v13 }
 0x5e7   :  { %1863 = vrcp.f32 %v1206_v8  ;;  %v1208_v16 = vadd.f32 1.0, %v1842_v14 }
 0x5e8   :  { %1865 = vrcp.f32 %v1207_v63 }
 0x5e9   :  { %1867 = vrcp.f32 %v1208_v16 }
 0x5ea   :  { %v1844_v18 = vpop.eup %1843  ;;  %1869 = vpow2.f32 %v1700_v15 }
 0x5eb   :  { %v1846_v32 = vpop.eup %1845  ;;  %v1605_v57 = vadd.f32 1.0, %v1844_v18  ;;  %1871 = vpow2.f32 %v1701_v17 }
 0x5ec   :  { %v1848_v54 = vpop.eup %1847  ;;  %v1606_v42 = vadd.f32 1.0, %v1846_v32  ;;  %1873 = vpow2.f32 %v1702_v56 }
 0x5ed   :  { %v1850_v0 = vpop.eup %1849  ;;  %v1227_v58 = vmul.f32 %v1848_v54, %v2506_v22  ;;  %1875 = vrcp.f32 %v1605_v57 }
 0x5ee   :  { %v1852_v55 = vpop.eup %1851  ;;  %v1228_v19 = vmul.f32 %v1850_v0, %v2508_v49  ;;  %1877 = vrcp.f32 %v1606_v42 }
 0x5ef   :  { %v1854_v6 = vpop.eup %1853  ;;  %1235 = vst [vmem:[%s2669_s9 + $0x10] sm:$0xff] %v1227_v58  ;;  %v1225_v12 = vmul.f32 %v1852_v55, %v2518_v10 }
 0x5f0   :  { %v1856_v59 = vpop.eup %1855  ;;  %1236 = vst [vmem:[%s2669_s9 + $0x18] sm:$0xff] %v1228_v19  ;;  %v1226_v53 = vmul.f32 %v1854_v6, %v2520_v11 }
 0x5f1   :  { %v1858_v22 = vpop.eup %1857  ;;  %1233 = vst [vmem:[%s2669_s9] sm:$0xff] %v1225_v12  ;;  %v1603_v49 = vadd.f32 1.0, %v1856_v59 }
 0x5f2   :  { %v1860_v21 = vpop.eup %1859  ;;  %1234 = vst [vmem:[%s2669_s9 + $0x8] sm:$0xff] %v1226_v53  ;;  %v1604_v50 = vadd.f32 1.0, %v1858_v22 }
 0x5f3   :  { %v1862_v10 = vpop.eup %1861  ;;  %1879 = vrcp.f32 %v1603_v49  ;;  %v1607_v43 = vadd.f32 1.0, %v1860_v21 }
 0x5f4   :  { %v1864_v23 = vpop.eup %1863  ;;  %v1229_v41 = vmul.f32 %v1862_v10, %v2532_v26  ;;  %1881 = vrcp.f32 %v1604_v50 }
 0x5f5   :  { %v1866_v11 = vpop.eup %1865  ;;  %v1230_v36 = vmul.f32 %v1864_v23, %v2534_v48  ;;  %1883 = vrcp.f32 %v1607_v43 }
 0x5f6   :  { %v1868_v52 = vpop.eup %1867  ;;  %1237 = vst [vmem:[%s2669_s9 + $0x20] sm:$0xff] %v1229_v41  ;;  %v1231_v2 = vmul.f32 %v1866_v11, %v2536_v29 }
 0x5f7   :  { %v1870_v3 = vpop.eup %1869  ;;  %1238 = vst [vmem:[%s2669_s9 + $0x28] sm:$0xff] %v1230_v36  ;;  %v1232_v60 = vmul.f32 %v1868_v52, %v2538_v38 }
 0x5f8   :  { %v1872_v26 = vpop.eup %1871  ;;  %1239 = vst [vmem:[%s2669_s9 + $0x30] sm:$0xff] %v1231_v2  ;;  %v1608_v48 = vadd.f32 1.0, %v1870_v3 }
 0x5f9   :  { %v1874_v9 = vpop.eup %1873  ;;  %1240 = vst [vmem:[%s2669_s9 + $0x38] sm:$0xff] %v1232_v60  ;;  %v1609_v25 = vadd.f32 1.0, %v1872_v26 }
 0x5fa   :  { %v1876_v29 = vpop.eup %1875  ;;  %1885 = vrcp.f32 %v1608_v48  ;;  %v1610_v27 = vadd.f32 1.0, %v1874_v9 }
 0x5fb   :  { %v1878_v28 = vpop.eup %1877  ;;  %v1629_v34 = vmul.f32 %v1876_v29, %v2551_v20  ;;  %1887 = vrcp.f32 %v1609_v25 }
 0x5fc   :  { %v1630_v38 = vmul.f32 %v1878_v28, %v2554_v44  ;;  %1889 = vrcp.f32 %v1610_v27 }
 0x5fd   :  { %1705 = vst [vmem:[%s2669_s9 + $0x50] sm:$0xff] %v1629_v34 }
 0x5fe   :  { %1706 = vst [vmem:[%s2669_s9 + $0x58] sm:$0xff] %v1630_v38 }
 0x600   :  { %v1880_v61 = vpop.eup %1879 }
 0x601   :  { %v1882_v31 = vpop.eup %1881  ;;  %v1627_v35 = vmul.f32 %v1880_v61, %v2564_v1 }
 0x602   :  { %v1884_v37 = vpop.eup %1883  ;;  %v1628_v4 = vmul.f32 %v1882_v31, %v2568_v24 }
 0x603   :  { %1703 = vst [vmem:[%s2669_s9 + $0x40] sm:$0xff] %v1627_v35  ;;  %v1631_v20 = vmul.f32 %v1884_v37, %v2580_v39 }
 0x604   :  { %1704 = vst [vmem:[%s2669_s9 + $0x48] sm:$0xff] %v1628_v4 }
 0x605   :  { %1707 = vst [vmem:[%s2669_s9 + $0x60] sm:$0xff] %v1631_v20 }
 0x607   :  { %v1886_v44 = vpop.eup %1885 }
 0x608   :  { %v1888_v30 = vpop.eup %1887  ;;  %v1632_v1 = vmul.f32 %v1886_v44, %v2584_v40 }
 0x609   :  { %v1890_v33 = vpop.eup %1889  ;;  %v1633_v24 = vmul.f32 %v1888_v30, %v2588_v7 }
 0x60a   :  { %1708 = vst [vmem:[%s2669_s9 + $0x68] sm:$0xff] %v1632_v1  ;;  %v1634_v39 = vmul.f32 %v1890_v33, %v2591_v62 }
 0x60b   :  { %1709 = vst [vmem:[%s2669_s9 + $0x70] sm:$0xff] %v1633_v24 }
 0x60c   :  { %1710 = vst [vmem:[%s2669_s9 + $0x78] sm:$0xff] %v1634_v39 }

</bundles_post_ra>
